<compile_context>
chip_gen: v7x
topology: tpu7x:2x2x1
jax: 0.10.0
libtpu: 0.0.40
codegen_flags: <defaults>
</compile_context>

<pallas_src>
import functools

import jax
import jax.numpy as jnp
import numpy as np
from jax.experimental import pallas as pl
from jax.experimental.pallas import tpu as pltpu

LN_EPS = 1e-5
LANE = 128


def _round_up(v, m):
    return (v + m - 1) // m * m


def _pad2(a, rows, cols):
    return jnp.zeros((rows, cols), a.dtype).at[: a.shape[0], : a.shape[1]].set(a)


def _pick_tile(n_pad, cap):
    for cand in (1024, 512, 256, 128):
        if cand <= cap and n_pad % cand == 0:
            return cand
    return 128


def _vmem_budget_bytes():
    # ~75% of per-core VMEM: ~48 MiB on v7x, ~96 MiB on v5e/v6e.
    try:
        cap = pltpu.get_tpu_info().vmem_capacity_bytes
    except Exception:
        cap = 64 * 2**20
    return int(cap) * 3 // 4


def _masked_layernorm(x, gamma, beta, c_true):
    """LayerNorm over the last axis, ignoring zero-padded lanes >= c_true."""
    c_pad = x.shape[-1]
    if c_true == c_pad:
        mu = jnp.mean(x, axis=-1, keepdims=True)
        d = x - mu
        var = jnp.mean(d * d, axis=-1, keepdims=True)
    else:
        # Padded lanes of x are zero by construction, so plain sums are exact.
        inv_c = 1.0 / c_true
        mask = (jax.lax.broadcasted_iota(jnp.int32, (1, c_pad), 1) < c_true
                ).astype(x.dtype)
        mu = jnp.sum(x, axis=-1, keepdims=True) * inv_c
        d = (x - mu) * mask
        var = jnp.sum(d * d, axis=-1, keepdims=True) * inv_c
    return d * jax.lax.rsqrt(var + LN_EPS) * gamma + beta


# ------------------------------- kernel -------------------------------------

def gin_conv_kernel(kidx_ref, cnt_ref, a_ref, xk_ref, w1_ref, w2_ref,
                    v1_ref, v2_ref, o_ref, acc_ref, *,
                    hidden_true, out_true, apply_post_ln, chunk):
    i = pl.program_id(0)
    k = pl.program_id(1)

    @pl.when(k == 0)
    def _init():
        acc_ref[...] = jnp.zeros_like(acc_ref)

    # Aggregation over nonzero adjacency tiles only; (1+eps)*x self term is in
    # the adjacency diagonal.  bf16 MXU inputs, f32 accumulation.
    @pl.when(k < cnt_ref[i])
    def _accum():
        acc_ref[...] += jnp.dot(a_ref[...], xk_ref[...],
                                preferred_element_type=jnp.float32)

    @pl.when(k == pl.num_programs(1) - 1)
    def _epilogue():
        # Vector params (hoisted out of the chunk loop).
        b1 = v1_ref[0:1, :]
        g1 = v1_ref[1:2, :]
        be1 = v1_ref[2:3, :]
        b2 = v2_ref[0:1, :]
        tm = acc_ref.shape[0]
        n_chunks = tm // chunk

        def body(c, carry):
            r0 = pl.multiple_of(c * chunk, chunk)
            h = acc_ref[pl.ds(r0, chunk), :]
            # GINConv update MLP: Linear -> ReLU -> LayerNorm -> Linear,
            # bf16 MXU inputs, f32 accumulation / activations.
            z = jnp.dot(h.astype(jnp.bfloat16), w1_ref[...],
                        preferred_element_type=jnp.float32) + b1
            z = jnp.maximum(z, 0.0)
            z = _masked_layernorm(z, g1, be1, hidden_true)
            out = jnp.dot(z.astype(jnp.bfloat16), w2_ref[...],
                          preferred_element_type=jnp.float32) + b2
            if apply_post_ln:
                # Fused outer GIN LayerNorm belonging to the *next* layer
                # (dropout p = 0.0 is identity, so order is preserved).
                og = v2_ref[1:2, :]
                ob = v2_ref[2:3, :]
                out = _masked_layernorm(out, og, ob, out_true)
            o_ref[pl.ds(r0, chunk), :] = out.astype(o_ref.dtype)
            return carry

        jax.lax.fori_loop(0, n_chunks, body, None, unroll=True)


def gin_conv_layer(x, adj, kidx, cnt, w1, w2, vec1, vec2, *, hidden_true,
                   out_true, apply_post_ln, out_dtype, tm, tk):
    n_pad, cin_pad = x.shape
    h_pad = w1.shape[1]
    cout_pad = w2.shape[1]
    assert n_pad % tm == 0 and n_pad % tk == 0
    grid = (n_pad // tm, n_pad // tk)
    chunk = min(tm, 256)

    kernel = functools.partial(gin_conv_kernel, hidden_true=hidden_true,
                               out_true=out_true, apply_post_ln=apply_post_ln,
                               chunk=chunk)

    const = lambda i, k, kidx_ref, cnt_ref: (0, 0)
    in_specs = [
        # adjacency tile (bf16): data-dependent column-tile index.
        pl.BlockSpec((tm, tk), lambda i, k, kidx_ref, cnt_ref: (i, kidx_ref[i, k])),
        # x source rows (bf16): same column-tile index.
        pl.BlockSpec((tk, cin_pad), lambda i, k, kidx_ref, cnt_ref: (kidx_ref[i, k], 0)),
        pl.BlockSpec((cin_pad, h_pad), const),   # w1 (bf16)
        pl.BlockSpec((h_pad, cout_pad), const),  # w2 (bf16)
        pl.BlockSpec((8, h_pad), const),         # [b1, ln_g, ln_b, ...] slab (f32)
        pl.BlockSpec((8, cout_pad), const),      # [b2, outer_g, outer_b, ...] slab
    ]
    out_specs = pl.BlockSpec((tm, cout_pad), lambda i, k, kidx_ref, cnt_ref: (i, 0))

    # VMEM request: double-buffered streamed blocks + resident weights + scratch.
    out_bytes = jnp.dtype(out_dtype).itemsize
    stream_b = 2 * (tm * tk * 2 + tk * cin_pad * 2 + tm * cout_pad * out_bytes)
    weights_b = 2 * (cin_pad * h_pad * 2 + h_pad * cout_pad * 2
                     + 8 * h_pad * 4 + 8 * cout_pad * 4)
    est = stream_b + weights_b + tm * cin_pad * 4
    vmem_limit = int(min(_vmem_budget_bytes(), max(32 * 2**20, 2 * est)))

    cost = pl.CostEstimate(
        flops=2 * n_pad * n_pad * cin_pad
        + 2 * n_pad * (cin_pad * h_pad + h_pad * cout_pad),
        transcendentals=2 * n_pad,
        bytes_accessed=n_pad * n_pad * 2                      # adjacency (dense upper bound)
        + (n_pad // tm) * n_pad * cin_pad * 2                 # x re-read per row tile
        + n_pad * cout_pad * out_bytes                        # output
        + weights_b,
    )

    return pl.pallas_call(
        kernel,
        out_shape=jax.ShapeDtypeStruct((n_pad, cout_pad), out_dtype),
        grid_spec=pltpu.PrefetchScalarGridSpec(
            num_scalar_prefetch=2,
            grid=grid,
            in_specs=in_specs,
            out_specs=out_specs,
            scratch_shapes=[pltpu.VMEM((tm, cin_pad), jnp.float32)],
        ),
        compiler_params=pltpu.CompilerParams(
            dimension_semantics=("parallel", "arbitrary"),
            vmem_limit_bytes=vmem_limit,
        ),
        cost_estimate=cost,
    )(kidx, cnt, adj, x, w1, w2, vec1, vec2)


# --------------------------- wrapper / forward --------------------------------

def _build_tile_map(src, dst, nodes, n_pad, tm, tk):
    """Per-row-tile sorted list of nonzero column tiles (+ self-term diagonal)."""
    rt, kt = n_pad // tm, n_pad // tk
    tile_mask = (jnp.zeros((rt, kt), jnp.int32)
                 .at[dst // tm, src // tk].add(1)
                 .at[nodes // tm, nodes // tk].add(1)) > 0
    cnt = jnp.sum(tile_mask, axis=1).astype(jnp.int32)
    order = jnp.argsort(jnp.where(tile_mask, 0, 1), axis=1).astype(jnp.int32)
    pos = jnp.minimum(jnp.arange(kt, dtype=jnp.int32)[None, :],
                      jnp.maximum(cnt - 1, 0)[:, None])
    kidx = jnp.take_along_axis(order, pos, axis=1).astype(jnp.int32)
    return kidx, cnt


def _vec_slab(rows, width):
    slab = jnp.zeros((8, width), jnp.float32)
    for r, v in enumerate(rows):
        v = v.reshape(-1)
        slab = slab.at[r, : v.shape[0]].set(v)
    return slab


def gin_forward(x, edge_index, mlps, lns, *, tm=None, tk=None):
    n, c_in = x.shape
    n_layers = len(mlps)
    hidden = mlps[0]["w2"].shape[1]
    c_out = mlps[-1]["w2"].shape[1]

    # Pad N only to a lane multiple; pick tiles that divide it (>=2 row tiles
    # when possible so the "parallel" axis can feed both TCs on v7x).
    n_pad = _round_up(n, LANE)
    if tm is None:
        tm = _pick_tile(n_pad, min(1024, max(LANE, n_pad // 2)))
    if tk is None:
        tk = _pick_tile(n_pad, min(512, n_pad))
    assert n_pad % tm == 0 and n_pad % tk == 0

    cin_pad = _round_up(c_in, LANE)
    hid_pad = _round_up(hidden, LANE)
    cout_pad = _round_up(c_out, LANE)

    # Adjacency built directly at bf16, with the (1+eps)*x self term (eps = 0)
    # folded into the diagonal.  A[dst, src] += 1 (sum over incoming edges).
    src, dst = edge_index[0], edge_index[1]
    nodes = jnp.arange(n, dtype=jnp.int32)
    adj = (jnp.zeros((n_pad, n_pad), jnp.bfloat16)
           .at[dst, src].add(1.0)
           .at[nodes, nodes].add(1.0))

    kidx, cnt = _build_tile_map(src, dst, nodes, n_pad, tm, tk)

    # Streamed node features are bf16 end to end (the MXU consumes bf16 anyway).
    h = jnp.zeros((n_pad, cin_pad), jnp.bfloat16).at[:n, :c_in].set(
        x.astype(jnp.bfloat16))

    for i, mlp in enumerate(mlps):
        last = i == n_layers - 1
        ci_pad = cin_pad if i == 0 else hid_pad
        co = c_out if last else hidden
        co_pad = cout_pad if last else hid_pad

        w1 = _pad2(mlp["w1"], ci_pad, hid_pad).astype(jnp.bfloat16)
        w2 = _pad2(mlp["w2"], hid_pad, co_pad).astype(jnp.bfloat16)
        vec1 = _vec_slab([mlp["b1"], mlp["ln_g"], mlp["ln_b"]], hid_pad)
        if last:
            vec2 = _vec_slab([mlp["b2"]], co_pad)
        else:
            g, b = lns[i]
            vec2 = _vec_slab([mlp["b2"], g, b], co_pad)

        h = gin_conv_layer(
            h, adj, kidx, cnt, w1, w2, vec1, vec2,
            hidden_true=hidden, out_true=co, apply_post_ln=not last,
            out_dtype=jnp.float32 if last else jnp.bfloat16, tm=tm, tk=tk)
    return h[:n, :c_out]


# --------------------------- parameter setup --------------------------------

def _kaiming_linear(key, fan_in, fan_out):
    # nn.init.kaiming_normal_(weight, nonlinearity='relu'), weight is (out, in),
    # fan_in mode -> std = sqrt(2 / fan_in).  Stored transposed as (in, out).
    kw, kb = jax.random.split(key)
    w = jax.random.normal(kw, (fan_in, fan_out), jnp.float32) * np.sqrt(2.0 / fan_in)
    bound = 1.0 / np.sqrt(fan_in)   # default nn.Linear bias init
    b = jax.random.uniform(kb, (1, fan_out), jnp.float32, -bound, bound)
    return w, b


def make_mlp_params(key, c_in, c_hid, c_out):
    k1, k2 = jax.random.split(key)
    w1, b1 = _kaiming_linear(k1, c_in, c_hid)
    w2, b2 = _kaiming_linear(k2, c_hid, c_out)
    return dict(
        w1=w1, b1=b1,
        ln_g=jnp.ones((1, c_hid), jnp.float32),
        ln_b=jnp.zeros((1, c_hid), jnp.float32),
        w2=w2, b2=b2,
    )


def make_gin_params(key, c_in, c_hid, c_out, n_layers):
    keys = jax.random.split(key, n_layers)
    mlps = [make_mlp_params(keys[0], c_in, c_hid, c_hid)]
    for i in range(n_layers - 2):
        mlps.append(make_mlp_params(keys[1 + i], c_hid, c_hid, c_hid))
    mlps.append(make_mlp_params(keys[n_layers - 1], c_hid, c_hid, c_out))
    # n_layers - 1 outer LayerNorms (applied before layers 1 .. n_layers-1).
    lns = [(jnp.ones((1, c_hid), jnp.float32), jnp.zeros((1, c_hid), jnp.float32))
           for _ in range(n_layers - 1)]
    return mlps, lns


# --------------------------- pure-JAX references -----------------------------

def _ln_ref(x, g, b):
    mu = jnp.mean(x, axis=-1, keepdims=True)
    var = jnp.mean((x - mu) ** 2, axis=-1, keepdims=True)
    return (x - mu) * jax.lax.rsqrt(var + LN_EPS) * g + b


def gin_forward_ref(x, edge_index, mlps, lns, *, mixed):
    """mixed=True mirrors the kernel's bf16 MXU numerics; False = f32 (torch)."""
    n = x.shape[0]
    src, dst = edge_index[0], edge_index[1]
    adj = jnp.zeros((n, n), jnp.float32).at[dst, src].add(1.0)
    if mixed:
        adj_m = (adj + jnp.eye(n, dtype=jnp.float32)).astype(jnp.bfloat16)
    for i, p in enumerate(mlps):
        if i != 0:
            g, b = lns[i - 1]
            x = _ln_ref(x, g, b)            # dropout p = 0.0 is identity
        if mixed:
            xb = x.astype(jnp.bfloat16)
            h = jnp.dot(adj_m, xb, preferred_element_type=jnp.float32)
            z = jnp.dot(h.astype(jnp.bfloat16), p["w1"].astype(jnp.bfloat16),
                        preferred_element_type=jnp.float32) + p["b1"]
            z = jnp.maximum(z, 0.0)
            z = _ln_ref(z, p["ln_g"], p["ln_b"])
            x = jnp.dot(z.astype(jnp.bfloat16), p["w2"].astype(jnp.bfloat16),
                        preferred_element_type=jnp.float32) + p["b2"]
        else:
            h = x + adj @ x
            z = jnp.maximum(h @ p["w1"] + p["b1"], 0.0)
            z = _ln_ref(z, p["ln_g"], p["ln_b"])
            x = z @ p["w2"] + p["b2"]
    return x


if __name__ == "__main__":
    key = jax.random.PRNGKey(0)
    k_x, k_e, k_p = jax.random.split(key, 3)

    n_nodes, n_edges = 200, 800
    in_channels, hidden_channels, out_channels, n_layers = 8, 32, 16, 3

    x = jax.random.normal(k_x, (n_nodes, in_channels), jnp.float32)
    edge_index = jax.random.randint(k_e, (2, n_edges), 0, n_nodes, dtype=jnp.int32)

    mlps, lns = make_gin_params(k_p, in_channels, hidden_channels, out_channels,
                                n_layers)

    # tm=tk=128 -> padded N = 256, grid = (2, 2): exercises row tiling and the
    # K-reduction accumulator path even at small test sizes.
    out = jax.block_until_ready(gin_forward(x, edge_index, mlps, lns, tm=128, tk=128))
    assert out.shape == (n_nodes, out_channels)

    # Strict check vs a reference that mirrors the kernel numerics
    # (bf16 adjacency/x/weights on the MXU, f32 accumulation).
    ref_mixed = jax.block_until_ready(
        gin_forward_ref(x, edge_index, mlps, lns, mixed=True))
    np.testing.assert_allclose(np.asarray(out), np.asarray(ref_mixed),
                               rtol=5e-3, atol=5e-3)

    # Loose sanity check vs the full-f32 (torch-equivalent) reference; bf16
    # roundings compound across 3 layers, so this is intentionally lenient
    # (the strict correctness gate is the mirror check above).
    ref_f32 = jax.block_until_ready(
        gin_forward_ref(x, edge_index, mlps, lns, mixed=False))
    np.testing.assert_allclose(np.asarray(out), np.asarray(ref_f32),
                               rtol=1e-1, atol=1e-1)

    # Structured-sparse graph (edges only among the first 100 nodes): exercises
    # the block-sparse tile reordering + skipping path (row tile 1's only
    # nonzero adjacency tile is its diagonal block).
    edge_sparse = jax.random.randint(jax.random.PRNGKey(7), (2, 300), 0, 100,
                                     dtype=jnp.int32)
    out_s = jax.block_until_ready(gin_forward(x, edge_sparse, mlps, lns,
                                              tm=128, tk=128))
    ref_s = jax.block_until_ready(
        gin_forward_ref(x, edge_sparse, mlps, lns, mixed=True))
    np.testing.assert_allclose(np.asarray(out_s), np.asarray(ref_s),
                               rtol=5e-3, atol=5e-3)

    print("KERNEL_OK")
</pallas_src>

<mosaic_0001>
module attributes {stable_mosaic.version = 11 : i64} {
  func.func @gin_conv_kernel(%arg0: i32, %arg1: i32, %arg2: memref<2x2xi32, #tpu.memory_space<smem>>, %arg3: memref<2xi32, #tpu.memory_space<smem>>, %arg4: memref<128x128xbf16, #tpu.memory_space<vmem>>, %arg5: memref<128x128xbf16, #tpu.memory_space<vmem>>, %arg6: memref<128x128xbf16, #tpu.memory_space<vmem>>, %arg7: memref<128x128xbf16, #tpu.memory_space<vmem>>, %arg8: memref<8x128xf32, #tpu.memory_space<vmem>>, %arg9: memref<8x128xf32, #tpu.memory_space<vmem>>, %arg10: memref<128x128xbf16, #tpu.memory_space<vmem>>, %arg11: memref<128x128xf32, #tpu.memory_space<vmem>>) attributes {dimension_semantics = [#tpu.dimension_semantics<parallel>, #tpu.dimension_semantics<arbitrary>], iteration_bounds = array<i64: 2, 2>, scalar_prefetch = 2 : i64, scratch_operands = 1 : i64, tpu.core_type = #tpu.core_type<tc>, window_params = [{transform_indices = @transform_0, window_bounds = array<i64: 128, 128>}, {transform_indices = @transform_1, window_bounds = array<i64: 128, 128>}, {pipeline_mode = #tpu.pipeline_mode<synchronous>, transform_indices = @transform_2, window_bounds = array<i64: 128, 128>}, {pipeline_mode = #tpu.pipeline_mode<synchronous>, transform_indices = @transform_3, window_bounds = array<i64: 128, 128>}, {pipeline_mode = #tpu.pipeline_mode<synchronous>, transform_indices = @transform_4, window_bounds = array<i64: 8, 128>}, {pipeline_mode = #tpu.pipeline_mode<synchronous>, transform_indices = @transform_5, window_bounds = array<i64: 8, 128>}, {transform_indices = @transform_6, window_bounds = array<i64: 128, 128>}]} {
    %c0_i32 = arith.constant 0 : i32
    %0 = arith.cmpi eq, %arg1, %c0_i32 : i32
    %1 = arith.extui %0 : i1 to i32
    %c0_i32_0 = arith.constant 0 : i32
    %2 = arith.cmpi ne, %1, %c0_i32_0 : i32
    scf.if %2 {
      %cst = arith.constant 0.000000e+00 : f32
      %11 = vector.broadcast %cst : f32 to vector<128x128xf32>
      %c0 = arith.constant 0 : index
      %c0_3 = arith.constant 0 : index
      %12 = vector.load %arg11[%c0, %c0_3] : memref<128x128xf32, #tpu.memory_space<vmem>>, vector<128x128xf32>
      tpu.vector_store %arg11[%c0, %c0_3], %11 {strides = array<i32>} : memref<128x128xf32, #tpu.memory_space<vmem>>, vector<128x128xf32>,
    } else {
    }
    %3 = arith.index_cast %arg0 : i32 to index
    %4 = memref.load %arg3[%3] : memref<2xi32, #tpu.memory_space<smem>>
    %5 = arith.cmpi slt, %arg1, %4 : i32
    %6 = arith.extui %5 : i1 to i32
    %c0_i32_1 = arith.constant 0 : i32
    %7 = arith.cmpi ne, %6, %c0_i32_1 : i32
    scf.if %7 {
      %c0 = arith.constant 0 : index
      %c0_3 = arith.constant 0 : index
      %11 = vector.load %arg11[%c0, %c0_3] : memref<128x128xf32, #tpu.memory_space<vmem>>, vector<128x128xf32>
      %c0_4 = arith.constant 0 : index
      %c0_5 = arith.constant 0 : index
      %12 = vector.load %arg4[%c0_4, %c0_5] : memref<128x128xbf16, #tpu.memory_space<vmem>>, vector<128x128xbf16>
      %c0_6 = arith.constant 0 : index
      %c0_7 = arith.constant 0 : index
      %13 = vector.load %arg5[%c0_6, %c0_7] : memref<128x128xbf16, #tpu.memory_space<vmem>>, vector<128x128xbf16>
      %cst = arith.constant dense<0.000000e+00> : vector<128x128xf32>
      %14 = tpu.matmul %12, %13, %cst {dimension_numbers = #tpu.dot_dimension_numbers<[1], [0], [0], [1], [0, 0, 1, 1], [], []>} : vector<128x128xbf16>, vector<128x128xbf16>, vector<128x128xf32> -> vector<128x128xf32>
      %15 = arith.addf %11, %14 : vector<128x128xf32>
      %c0_8 = arith.constant 0 : index
      %c0_9 = arith.constant 0 : index
      %16 = vector.load %arg11[%c0_8, %c0_9] : memref<128x128xf32, #tpu.memory_space<vmem>>, vector<128x128xf32>
      tpu.vector_store %arg11[%c0_8, %c0_9], %15 {strides = array<i32>} : memref<128x128xf32, #tpu.memory_space<vmem>>, vector<128x128xf32>,
    } else {
    }
    %c1_i32 = arith.constant 1 : i32
    %8 = arith.cmpi eq, %arg1, %c1_i32 : i32
    %9 = arith.extui %8 : i1 to i32
    %c0_i32_2 = arith.constant 0 : i32
    %10 = arith.cmpi ne, %9, %c0_i32_2 : i32
    scf.if %10 {
      %c0 = arith.constant 0 : index
      %c0_3 = arith.constant 0 : index
      %11 = vector.load %arg8[%c0, %c0_3] : memref<8x128xf32, #tpu.memory_space<vmem>>, vector<1x128xf32>
      %c1 = arith.constant 1 : index
      %c0_4 = arith.constant 0 : index
      %12 = vector.load %arg8[%c1, %c0_4] : memref<8x128xf32, #tpu.memory_space<vmem>>, vector<1x128xf32>
      %c2 = arith.constant 2 : index
      %c0_5 = arith.constant 0 : index
      %13 = vector.load %arg8[%c2, %c0_5] : memref<8x128xf32, #tpu.memory_space<vmem>>, vector<1x128xf32>
      %c0_6 = arith.constant 0 : index
      %c0_7 = arith.constant 0 : index
      %14 = vector.load %arg9[%c0_6, %c0_7] : memref<8x128xf32, #tpu.memory_space<vmem>>, vector<1x128xf32>
      %c0_i32_8 = arith.constant 0 : i32
      %c128_i32 = arith.constant 128 : i32
      %15 = arith.muli %c0_i32_8, %c128_i32 : i32
      %16 = tpu.assume_multiple %15, 128 : i32
      %17 = arith.index_cast %16 : i32 to index
      %c0_9 = arith.constant 0 : index
      %18 = vector.load %arg11[%17, %c0_9] : memref<128x128xf32, #tpu.memory_space<vmem>>, vector<128x128xf32>
      %19 = arith.truncf %18 : vector<128x128xf32> to vector<128x128xbf16>
      %c0_10 = arith.constant 0 : index
      %c0_11 = arith.constant 0 : index
      %20 = vector.load %arg6[%c0_10, %c0_11] : memref<128x128xbf16, #tpu.memory_space<vmem>>, vector<128x128xbf16>
      %cst = arith.constant dense<0.000000e+00> : vector<128x128xf32>
      %21 = tpu.matmul %19, %20, %cst {dimension_numbers = #tpu.dot_dimension_numbers<[1], [0], [0], [1], [0, 0, 1, 1], [], []>} : vector<128x128xbf16>, vector<128x128xbf16>, vector<128x128xf32> -> vector<128x128xf32>
      %22 = vector.broadcast %11 : vector<1x128xf32> to vector<128x128xf32>
      %23 = arith.addf %21, %22 : vector<128x128xf32>
      %cst_12 = arith.constant 0.000000e+00 : f32
      %24 = vector.broadcast %cst_12 : f32 to vector<128x128xf32>
      %25 = arith.maximumf %23, %24 : vector<128x128xf32>
      %26 = tpu.iota {dimensions = array<i32: 1>} : vector<1x128xi32>
      %c32_i32 = arith.constant 32 : i32
      %27 = vector.broadcast %c32_i32 : i32 to vector<1x128xi32>
      %28 = arith.cmpi slt, %26, %27 : vector<1x128xi32>
      %29 = arith.extui %28 : vector<1x128xi1> to vector<1x128xi32>
      %30 = arith.sitofp %29 : vector<1x128xi32> to vector<1x128xf32>
      %cst_13 = arith.constant dense<0.000000e+00> : vector<128xf32>
      %31 = vector.multi_reduction <add>, %25, %cst_13 [1] : vector<128x128xf32> to vector<128xf32>
      %32 = vector.shape_cast %31 : vector<128xf32> to vector<128x1xf32>
      %cst_14 = arith.constant 3.125000e-02 : f32
      %33 = vector.broadcast %cst_14 : f32 to vector<128x1xf32>
      %34 = arith.mulf %32, %33 : vector<128x1xf32>
      %35 = vector.broadcast %34 : vector<128x1xf32> to vector<128x128xf32>
      %36 = arith.subf %25, %35 : vector<128x128xf32>
      %37 = vector.broadcast %30 : vector<1x128xf32> to vector<128x128xf32>
      %38 = arith.mulf %36, %37 : vector<128x128xf32>
      %39 = arith.mulf %38, %38 : vector<128x128xf32>
      %cst_15 = arith.constant dense<0.000000e+00> : vector<128xf32>
      %40 = vector.multi_reduction <add>, %39, %cst_15 [1] : vector<128x128xf32> to vector<128xf32>
      %41 = vector.shape_cast %40 : vector<128xf32> to vector<128x1xf32>
      %cst_16 = arith.constant 3.125000e-02 : f32
      %42 = vector.broadcast %cst_16 : f32 to vector<128x1xf32>
      %43 = arith.mulf %41, %42 : vector<128x1xf32>
      %cst_17 = arith.constant 9.99999974E-6 : f32
      %44 = vector.broadcast %cst_17 : f32 to vector<128x1xf32>
      %45 = arith.addf %43, %44 : vector<128x1xf32>
      %46 = math.rsqrt %45 : vector<128x1xf32>
      %47 = vector.broadcast %46 : vector<128x1xf32> to vector<128x128xf32>
      %48 = arith.mulf %38, %47 : vector<128x128xf32>
      %49 = vector.broadcast %12 : vector<1x128xf32> to vector<128x128xf32>
      %50 = arith.mulf %48, %49 : vector<128x128xf32>
      %51 = vector.broadcast %13 : vector<1x128xf32> to vector<128x128xf32>
      %52 = arith.addf %50, %51 : vector<128x128xf32>
      %53 = arith.truncf %52 : vector<128x128xf32> to vector<128x128xbf16>
      %c0_18 = arith.constant 0 : index
      %c0_19 = arith.constant 0 : index
      %54 = vector.load %arg7[%c0_18, %c0_19] : memref<128x128xbf16, #tpu.memory_space<vmem>>, vector<128x128xbf16>
      %cst_20 = arith.constant dense<0.000000e+00> : vector<128x128xf32>
      %55 = tpu.matmul %53, %54, %cst_20 {dimension_numbers = #tpu.dot_dimension_numbers<[1], [0], [0], [1], [0, 0, 1, 1], [], []>} : vector<128x128xbf16>, vector<128x128xbf16>, vector<128x128xf32> -> vector<128x128xf32>
      %56 = vector.broadcast %14 : vector<1x128xf32> to vector<128x128xf32>
      %57 = arith.addf %55, %56 : vector<128x128xf32>
      %c1_21 = arith.constant 1 : index
      %c0_22 = arith.constant 0 : index
      %58 = vector.load %arg9[%c1_21, %c0_22] : memref<8x128xf32, #tpu.memory_space<vmem>>, vector<1x128xf32>
      %c2_23 = arith.constant 2 : index
      %c0_24 = arith.constant 0 : index
      %59 = vector.load %arg9[%c2_23, %c0_24] : memref<8x128xf32, #tpu.memory_space<vmem>>, vector<1x128xf32>
      %60 = tpu.iota {dimensions = array<i32: 1>} : vector<1x128xi32>
      %c32_i32_25 = arith.constant 32 : i32
      %61 = vector.broadcast %c32_i32_25 : i32 to vector<1x128xi32>
      %62 = arith.cmpi slt, %60, %61 : vector<1x128xi32>
      %63 = arith.extui %62 : vector<1x128xi1> to vector<1x128xi32>
      %64 = arith.sitofp %63 : vector<1x128xi32> to vector<1x128xf32>
      %cst_26 = arith.constant dense<0.000000e+00> : vector<128xf32>
      %65 = vector.multi_reduction <add>, %57, %cst_26 [1] : vector<128x128xf32> to vector<128xf32>
      %66 = vector.shape_cast %65 : vector<128xf32> to vector<128x1xf32>
      %cst_27 = arith.constant 3.125000e-02 : f32
      %67 = vector.broadcast %cst_27 : f32 to vector<128x1xf32>
      %68 = arith.mulf %66, %67 : vector<128x1xf32>
      %69 = vector.broadcast %68 : vector<128x1xf32> to vector<128x128xf32>
      %70 = arith.subf %57, %69 : vector<128x128xf32>
      %71 = vector.broadcast %64 : vector<1x128xf32> to vector<128x128xf32>
      %72 = arith.mulf %70, %71 : vector<128x128xf32>
      %73 = arith.mulf %72, %72 : vector<128x128xf32>
      %cst_28 = arith.constant dense<0.000000e+00> : vector<128xf32>
      %74 = vector.multi_reduction <add>, %73, %cst_28 [1] : vector<128x128xf32> to vector<128xf32>
      %75 = vector.shape_cast %74 : vector<128xf32> to vector<128x1xf32>
      %cst_29 = arith.constant 3.125000e-02 : f32
      %76 = vector.broadcast %cst_29 : f32 to vector<128x1xf32>
      %77 = arith.mulf %75, %76 : vector<128x1xf32>
      %cst_30 = arith.constant 9.99999974E-6 : f32
      %78 = vector.broadcast %cst_30 : f32 to vector<128x1xf32>
      %79 = arith.addf %77, %78 : vector<128x1xf32>
      %80 = math.rsqrt %79 : vector<128x1xf32>
      %81 = vector.broadcast %80 : vector<128x1xf32> to vector<128x128xf32>
      %82 = arith.mulf %72, %81 : vector<128x128xf32>
      %83 = vector.broadcast %58 : vector<1x128xf32> to vector<128x128xf32>
      %84 = arith.mulf %82, %83 : vector<128x128xf32>
      %85 = vector.broadcast %59 : vector<1x128xf32> to vector<128x128xf32>
      %86 = arith.addf %84, %85 : vector<128x128xf32>
      %87 = arith.truncf %86 : vector<128x128xf32> to vector<128x128xbf16>
      %88 = arith.index_cast %16 : i32 to index
      %c0_31 = arith.constant 0 : index
      %89 = vector.load %arg10[%88, %c0_31] : memref<128x128xbf16, #tpu.memory_space<vmem>>, vector<128x128xbf16>
      tpu.vector_store %arg10[%88, %c0_31], %87 {strides = array<i32>} : memref<128x128xbf16, #tpu.memory_space<vmem>>, vector<128x128xbf16>,
      %c1_i32_32 = arith.constant 1 : i32
    } else {
    }
    return
  }
  func.func @transform_0(%arg0: i32, %arg1: i32, %arg2: memref<2x2xi32, #tpu.memory_space<smem>>, %arg3: memref<2xi32, #tpu.memory_space<smem>>) -> (i32, i32) {
    %0 = arith.index_cast %arg0 : i32 to index
    %1 = arith.index_cast %arg1 : i32 to index
    %2 = memref.load %arg2[%0, %1] : memref<2x2xi32, #tpu.memory_space<smem>>
    %c0_i32 = arith.constant 0 : i32
    return %arg0, %2 : i32, i32
  }
  func.func @transform_1(%arg0: i32, %arg1: i32, %arg2: memref<2x2xi32, #tpu.memory_space<smem>>, %arg3: memref<2xi32, #tpu.memory_space<smem>>) -> (i32, i32) {
    %0 = arith.index_cast %arg0 : i32 to index
    %1 = arith.index_cast %arg1 : i32 to index
    %2 = memref.load %arg2[%0, %1] : memref<2x2xi32, #tpu.memory_space<smem>>
    %c0_i32 = arith.constant 0 : i32
    %c0_i32_0 = arith.constant 0 : i32
    return %2, %c0_i32 : i32, i32
  }
  func.func @transform_2(%arg0: i32, %arg1: i32, %arg2: memref<2x2xi32, #tpu.memory_space<smem>>, %arg3: memref<2xi32, #tpu.memory_space<smem>>) -> (i32, i32) {
    %c0_i32 = arith.constant 0 : i32
    %c0_i32_0 = arith.constant 0 : i32
    %c0_i32_1 = arith.constant 0 : i32
    return %c0_i32, %c0_i32_0 : i32, i32
  }
  func.func @transform_3(%arg0: i32, %arg1: i32, %arg2: memref<2x2xi32, #tpu.memory_space<smem>>, %arg3: memref<2xi32, #tpu.memory_space<smem>>) -> (i32, i32) {
    %c0_i32 = arith.constant 0 : i32
    %c0_i32_0 = arith.constant 0 : i32
    %c0_i32_1 = arith.constant 0 : i32
    return %c0_i32, %c0_i32_0 : i32, i32
  }
  func.func @transform_4(%arg0: i32, %arg1: i32, %arg2: memref<2x2xi32, #tpu.memory_space<smem>>, %arg3: memref<2xi32, #tpu.memory_space<smem>>) -> (i32, i32) {
    %c0_i32 = arith.constant 0 : i32
    %c0_i32_0 = arith.constant 0 : i32
    %c0_i32_1 = arith.constant 0 : i32
    return %c0_i32, %c0_i32_0 : i32, i32
  }
  func.func @transform_5(%arg0: i32, %arg1: i32, %arg2: memref<2x2xi32, #tpu.memory_space<smem>>, %arg3: memref<2xi32, #tpu.memory_space<smem>>) -> (i32, i32) {
    %c0_i32 = arith.constant 0 : i32
    %c0_i32_0 = arith.constant 0 : i32
    %c0_i32_1 = arith.constant 0 : i32
    return %c0_i32, %c0_i32_0 : i32, i32
  }
  func.func @transform_6(%arg0: i32, %arg1: i32, %arg2: memref<2x2xi32, #tpu.memory_space<smem>>, %arg3: memref<2xi32, #tpu.memory_space<smem>>) -> (i32, i32) {
    %c0_i32 = arith.constant 0 : i32
    %c0_i32_0 = arith.constant 0 : i32
    return %arg0, %c0_i32 : i32, i32
  }
}

</mosaic_0001>

<bundles_post_ra>
// kernel: tpu_custom_call.1
= control target key start
LH: loop header
LB: loop body
LE: loop exit
PB: predicated region body
PF: predicated region fallthrough
CT: control target
= control target key end

     0   :  { %s3700_s0 = inlined_call_operand.hbm [shape: s32[2,2], index: 0, kind: input, shape index: {}]   ;;  %s3701_s2 = inlined_call_operand.hbm [shape: bf16[256,256], index: 2, kind: input, shape index: {}]   ;;  %s3702_s3 = inlined_call_operand.hbm [shape: bf16[256,128], index: 3, kind: input, shape index: {}]   ;;  %s3703_s4 = inlined_call_operand.hbm [shape: bf16[128,128], index: 4, kind: input, shape index: {}]   ;;  %s3704_s5 = inlined_call_operand.hbm [shape: bf16[128,128], index: 5, kind: input, shape index: {}]   ;;  %s3705_s6 = inlined_call_operand.vmem [shape: f32[8,128], index: 6, kind: input, shape index: {}]   ;;  %s3706_s7 = inlined_call_operand.vmem [shape: f32[8,128], index: 7, kind: input, shape index: {}]   ;;  %s3707_s8 = inlined_call_operand.hbm [shape: bf16[256,128], index: 8, kind: output, shape index: {}]   ;;  %s3708_s1 = inlined_call_operand.vmem [shape: s32[2], index: 1, kind: input, shape index: {}]  }
   0x1   :  { %3733 = sst [smem:[#allocation37_spill]] %s3703_s4  ;;  %s2389_s29 = scalar_lea.hbm %s3700_s0, 32 }
   0x2   :  { %3734 = sst [smem:[#allocation38_spill]] %s3704_s5  ;;  %p2390_p0 = scmp.ne.s32.totalorder %s3700_s0, %s2389_s29 }
   0x3   :  { %3735 = sst [smem:[#allocation39_spill]] %s3705_s6  ;;  %p2393_p1 = scmp.lt.u32.totalorder %s2389_s29, %s3700_s0 }
   0x4   :  { %3736 = sst [smem:[#allocation40_spill]] %s3706_s7 }
   0x5   :  { %3737 = sst [smem:[#allocation41_spill]] %s3707_s8  ;;  %p2395_p2 = pnand %p2393_p1, %p2390_p0 }
   0x7   :  { %2398 = shalt.err (!%p2395_p2)  }
   0x8   :  { %s2689_s12 = smov [#allocation4]   ;;  %s15_s17 = sshll.u32 %s3708_s1, 4  ;;  %s16_s17 = int_to_ptr.vmem [resolvable:$true] %s15_s17 }
   0x9   :  { %14 = dma.hbm_to_smem %s3700_s0, 32, %s2689_s12, [#allocation3] }
   0xa   :  { %s2399_s18 = scalar_lea.vmem %s16_s17, 16  ;;  %p2404_p4 = scmp.lt.s32.totalorder %s16_s17, %s16_s17 }
   0xb   :  { %p2400_p3 = scmp.ne.s32.totalorder %s16_s17, %s2399_s18  ;;  %p2405_p5 = scmp.lt.s32.totalorder %s2399_s18, %s2399_s18 }
   0xd   :  { %p2406_p6 = por %p2405_p5, %p2404_p4 }
   0xf   :  { %p2407_p7 = pnand %p2406_p6, %p2400_p3 }
  0x11   :  { %2410 = shalt.err (!%p2407_p7)  }
  0x12   :  { %s2690_s19 = smov [#allocation5]  }
  0x13   :  { %18 = dma.vmem_to_smem %s16_s17, 16, %s2690_s19, [#allocation3] }
  0x14   :  { %2611 = dma.done.wait [#allocation3], 48 }
  0x15   :  { %2612 = vsyncadd [#allocation3], 4294967248 }
  0x16   :  { %20 = sfence }
  0x17   :  { %21 = vsyncpa [#allocation7], 0 }
  0x18   :  { %23 = vsyncpa [#allocation7 + $0x1], 0 }
  0x19   :  { %24 = vsyncpa [#allocation10], 0 }
  0x1a   :  { %26 = vsyncpa [#allocation10 + $0x1], 0 }
  0x1b   :  { %27 = vsyncpa [#allocation13], 0 }
  0x1c   :  { %28 = vsyncpa [#allocation8], 0 }
  0x1d   :  { %30 = vsyncpa [#allocation8 + $0x1], 0  ;;  %s2763_s0 = smov 0   ;;  %s2765_s1 = smov 0  }
  0x1e   :  { %s2767_s20 = smov 0   ;;  %s2769_s21 = smov 0  }
  0x1f   :  { %s2771_s22 = smov 0   ;;  %s2773_s23 = smov 0  }
  0x20   :  { %s2775_s24 = smov 0   ;;  %s2777_s25 = smov 0  }
  0x21   :  { %s2779_s26 = smov 0   ;;  %s2781_s27 = smov 0  }
  0x22   :  { %s2783_s28 = smov 0   ;;  %s2785_s29 = smov 0  }
  0x23   :  { %s2787_s30 = smov 0   ;;  %s2789_s9 = smov 0  }
  0x24 LB: > { %3738 = sst [smem:[#allocation25_spill]] %s2635_s0  ;;  %s2830_s10 = sadd.s32 4294967295, %s2687_s9   ;;  %s2687_s9 = sphi %s2789_s9, %s36_s9   ;;  %s2683_s30 = sphi %s2787_s30, %s3808_s30   ;;  %s2679_s29 = sphi %s2785_s29, %s3797_s29   ;;  %s2675_s28 = sphi %s2783_s28, %s3796_s28   ;;  %s2671_s27 = sphi %s2781_s27, %s3795_s27   ;;  %s2667_s26 = sphi %s2779_s26, %s3807_s26   ;;  %s2663_s25 = sphi %s2777_s25, %s3806_s25   ;;  %s2659_s24 = sphi %s2775_s24, %s3805_s24   ;;  %s2655_s23 = sphi %s2773_s23, %s3804_s23   ;;  %s2651_s22 = sphi %s2771_s22, %s3803_s22   ;;  %s2647_s21 = sphi %s2769_s21, %s3802_s21   ;;  %s2643_s20 = sphi %s2767_s20, %s3793_s20   ;;  %s2639_s1 = sphi %s2765_s1, %s3801_s1   ;;  %s2635_s0 = sphi %s2763_s0, %s3800_s0  }
  0x25   : > { %3739 = sst [smem:[#allocation26_spill]] %s2643_s20  ;;  %p86_p8 = scmp.ne.s32.totalorder %s2663_s25, %s2659_s24 }
  0x26   : > { %3740 = sst [smem:[#allocation27_spill]] %s2671_s27  ;;  %p3715_p9 = scmp.eq.s32.totalorder %s2830_s10, 0 }
  0x27   : > { %3741 = sst [smem:[#allocation28_spill]] %s2675_s28  ;;  %s1811_s11 = sadd.s32 4294967294, %s2687_s9  }
  0x28   : > { %3742 = sst [smem:[#allocation29_spill]] %s2679_s29  ;;  %p128_p10 = scmp.ne.s32.totalorder %s2651_s22, %s2647_s21 }
  0x29   : > { %3743 = sst [smem:[#allocation30_spill]] %s2683_s30  ;;  %p2838_p11 = por %p3715_p9, %p86_p8 }
  0x2a   : > { %p235_p12 = scmp.ne.s32.totalorder %s2643_s20, %s2639_s1  ;;  %p2846_p13 = por %p128_p10, %p3715_p9 }
  0x2b   : > { %s3744_s12 = scalar_select %p2838_p11, 1, 0 }
  0x2c   : > { %s3745_s13 = scalar_select %p2846_p13, 1, 0 }
  0x2d   : > { %p236_p0 = scmp.eq.s32.totalorder %s2830_s10, 3  ;;  %p241_p1 = scmp.ne.s32.totalorder %s2639_s1, %s2635_s0 }
  0x2e   : > { %p242_p2 = scmp.eq.s32.totalorder %s1811_s11, 3  ;;  %p1816_p4 = scmp.ge.s32.totalorder %s2687_s9, 1 }
  0x2f   : > { %p2853_p3 = por %p236_p0, %p235_p12  ;;  %p249_p6 = scmp.lt.s32.totalorder %s2687_s9, 5 }
  0x30   : > { %p2858_p5 = por %p242_p2, %p241_p1  ;;  %s2691_s17 = smov [#allocation11]  }
  0x31   : > { %s3746_s14 = scalar_select %p2853_p3, 1, 0 }
  0x32   : > { %s3748_s15 = scalar_select %p2858_p5, 1, 0 }
  0x33   : > { %3747 = sst [smem:[#allocation31_spill]] %s3746_s14  ;;  %p2863_p7 = pnand %p1816_p4, %p249_p6 }
  0x34   : > { %3749 = sst [smem:[#allocation32_spill]] %s3748_s15  ;;  %s261_s18 = sshll.u32 %s2691_s17, 4  ;;  %s262_s18 = int_to_ptr.vmem [resolvable:$true] %s261_s18 }
  0x35   : > { %s3750_s16 = scalar_select %p2863_p7, 1, 0 }
  0x36   : > { %p2142_p8 = pneg %p2863_p7  ;;  %s2692_s21 = smov [#allocation12]  }
  0x37   : > { %s274_s24 = sshll.u32 %s2692_s21, 4  ;;  %s3752_s4 = sld [smem:[#allocation37_spill]]  ;;  %s2875_s24 = int_to_ptr.vmem [resolvable:$true] %s274_s24 }
  0x38   : > { %p2871_p10 = pnand %p2142_p8, %p3715_p9 }
  0x3a   : > { %p2413_p0 = pneg %p2871_p10 }
  0x3d   : > { %s2411_s0 = scalar_lea.hbm %s3752_s4, 1024 }
  0x3e   : > { %p2412_p12 = scmp.ne.s32.totalorder %s3752_s4, %s2411_s0  ;;  %p2418_p4 = scmp.lt.u32.totalorder %s2411_s0, %s3752_s4 }
  0x40   : > { %p2414_p1 = pnand %p2413_p0, %p2412_p12 }
  0x42   : > { %p2415_p2 = pneg %p2414_p1 }
  0x44   : > { %p2420_p6 = pnand %p2418_p4, %p2415_p2 }
  0x46   : > { %2423 = shalt.err (!%p2420_p6)
}
  0x47   : > { %s2424_s21 = scalar_lea.vmem %s262_s18, 1024  ;;  %p2432_p3 = scmp.lt.s32.totalorder %s262_s18, %s262_s18 }
  0x48   : > { %p2425_p8 = scmp.ne.s32.totalorder %s262_s18, %s2424_s21  ;;  %p2433_p13 = scmp.lt.s32.totalorder %s2424_s21, %s2424_s21 }
  0x4a   : > { %p2427_p9 = pnand %p2425_p8, %p2413_p0  ;;  %p2434_p11 = por %p2433_p13, %p2432_p3 }
  0x4c   : > { %p2428_p5 = pneg %p2427_p9 }
  0x4e   : > { %p2435_p7 = pnand %p2434_p11, %p2428_p5 }
  0x50   : > { %2438 = shalt.err (!%p2435_p7)
}
  0x51   : > { %s3721_s8 = smov 64   ;;  %s3723_s15 = smov 4  }
  0x52   : > { %2145 = dma.hbm_to_vmem [thread:$0]  (!%p2871_p10), %s3752_s4, 1024, %s262_s18, [#allocation10], %s3721_s8, %s3721_s8, %s3723_s15  }
  0x53   : > { %s3753_s5 = sld [smem:[#allocation38_spill]] }
  0x59   : > { %s2439_s17 = scalar_lea.hbm %s3753_s5, 1024 }
  0x5a   : > { %p2440_p9 = scmp.ne.s32.totalorder %s3753_s5, %s2439_s17  ;;  %p2446_p3 = scmp.lt.u32.totalorder %s2439_s17, %s3753_s5 }
  0x5c   : > { %p2442_p11 = pnand %p2440_p9, %p2413_p0 }
  0x5e   : > { %p2443_p13 = pneg %p2442_p11 }
  0x60   : > { %p2448_p5 = pnand %p2446_p3, %p2443_p13 }
  0x62   : > { %2451 = shalt.err (!%p2448_p5)
}
  0x63   : > { %s2452_s18 = scalar_lea.vmem %s2875_s24, 1024  ;;  %p2460_p2 = scmp.lt.s32.totalorder %s2875_s24, %s2875_s24 }
  0x64   : > { %p2453_p7 = scmp.ne.s32.totalorder %s2875_s24, %s2452_s18  ;;  %p2461_p4 = scmp.lt.s32.totalorder %s2452_s18, %s2452_s18 }
  0x66   : > { %p2455_p12 = pnand %p2453_p7, %p2413_p0  ;;  %p2462_p6 = por %p2461_p4, %p2460_p2 }
  0x68   : > { %p2456_p1 = pneg %p2455_p12 }
  0x6a   : > { %p2463_p8 = pnand %p2462_p6, %p2456_p1 }
  0x6c   : > { %2466 = shalt.err (!%p2463_p8)
}
  0x6d   : > { %2148 = dma.hbm_to_vmem [thread:$0]  (!%p2871_p10), %s3753_s5, 1024, %s2875_s24, [#allocation13], %s3721_s8, %s3721_s8, %s3723_s15  }
  0x6e   : > { %s45_s28 = sadd.s32 1, %s2679_s29  ;;  %s48_s7 = sadd.s32 1, %s2683_s30 }
  0x6f   : > { %p46_p0 = scmp.ge.s32.totalorder %s45_s28, 2  ;;  %s52_s19 = sshra.s32 %s2679_s29, 7 }
  0x70   : > { %s54_s0 = sadd.s32 %s2683_s30, %s52_s19  ;;  %s57_s14 = sand.u32 127, %s2679_s29 }
  0x71   : > { %s3810_s28 = smov (%p46_p0, %s45_s28), 0  ;;  %s3812_s7 = smov (!%p46_p0, %s48_s7), %s2683_s30 }
  0x72   : > { %3754 = sst [smem:[#allocation33_spill]] %s3810_s28  ;;  %s1812_s11 = sshll.u32 %s54_s0, 7 }
  0x73   : > { %p50_p9 = scmp.ge.s32.totalorder %s3812_s7, 2  ;;  %s2938_s24 = sadd.s32 %s1812_s11, %s57_s14 }
  0x74   : > { %s59_s17 = sld [smem:[#allocation4 + %s2938_s24]]  ;;  %s60_s21 = sshra.s32 %s3810_s28, 7 }
  0x75   : > { %s3814_s7 = smov (%p50_p9, %s3812_s7), 0  ;;  %s65_s18 = sand.u32 127, %s3810_s28 }
  0x76   : > { %3755 = sst [smem:[#allocation34_spill]] %s3814_s7  ;;  %p80_p10 = scmp.ne.s32.totalorder %s2667_s26, %s2663_s25 }
  0x77   : > { %s62_s6 = sadd.s32 %s60_s21, %s3814_s7  ;;  %s68_s27 = ssub.s32 %s2683_s30, %s3814_s7 }
  0x78   : > { %s1813_s19 = sshll.u32 %s62_s6, 7  ;;  %p81_p11 = scmp.eq.s32.totalorder %s2687_s9, 0 }
  0x79   : > { %s66_s0 = sadd.s32 %s1813_s19, %s65_s18  ;;  %s225_s14 = sadd.s32 1, %s2643_s20 }
  0x7a   : > { %s67_s11 = sld [smem:[#allocation4 + %s66_s0]]  ;;  %p2954_p13 = por %p81_p11, %p80_p10 }
  0x7b   : > { %p223_p3 = scmp.eq.s32.totalorder %s68_s27, 0  ;;  %p3731_p5 = scmp.lt.s32.totalorder %s2687_s9, 4 }
  0x7c   : > { %s3726_s21 = sand.u32 1, %s2667_s26   ;;  %s73_s4 = sadd.s32 1, %s2667_s26 }
  0x7d   : > { %s2961_s6 = scalar_select %p223_p3, %s2643_s20, %s225_s14  }
  0x7e   : > { %s1820_s18 = sshll.u32 %s3726_s21, 6  ;;  %p2969_p7 = pnand %p3731_p5, %p2954_p13 }
  0x7f   : > { %3757 = sst [smem:[#allocation35_spill]] %s2961_s6  ;;  %p122_p1 = scmp.ne.s32.totalorder %s2655_s23, %s2651_s22 }
  0x80   : > { %s69_s15 = ssub.s32 %s59_s17, %s67_s11  ;;  %s103_s28 = sld [smem:[#allocation4 + %s2938_s24]] }
  0x81   : > { %s70_s5 = sor.u32 %s69_s15, %s68_s27  ;;  %s298_s17 = scalar_lea.vmem [#allocation6], %s1820_s18 }
  0x82   : > { %p71_p12 = scmp.eq.s32.totalorder %s70_s5, 0  ;;  %s315_s11 = sshll.u32 %s298_s17, 4  ;;  %s2991_s11 = int_to_ptr.vmem [resolvable:$true] %s315_s11 }
  0x83   : > { %s2128_s14 = scalar_select %p2954_p13, [#allocation4], [#allocation15] }
  0x84   : > { %s2977_s7 = scalar_select %p71_p12, %s2667_s26, %s73_s4  }
  0x85   : > { %s2129_s21 = scalar_select %p2954_p13, %s2938_s24, 0 }
  0x86   : > { %3759 = sst [smem:[#allocation36_spill]] %s2977_s7  ;;  %s3816_s14 = smov (!%p3731_p5, %s2128_s14), [#allocation17] }
  0x87   : > { %s3818_s21 = smov (!%p3731_p5, %s2129_s21), 0  ;;  %s111_s6 = sld [smem:[#allocation4 + %s66_s0]] }
  0x88   : > { %s306_s29 = sld [smem:[%s3816_s14 + %s3818_s21]]  ;;  %s1898_s15 = sshll.u32 %s2683_s30, 5 }
  0x89   : > { %s327_s5 = sand.u32 1, %s2655_s23   ;;  %p2996_p2 = por %p122_p1, %p81_p11 }
  0x8a   : > { %s3000_s7 = sshll.u32 %s327_s5, 6  ;;  %s3762_s30 = sand.u32 1, %s2667_s26  }
  0x8b   : > { %s3760_s8 = scalar_select %p2996_p2, 1, 0 }
  0x8c   : > { %s3013_s20 = scalar_lea.sflag [#allocation7], %s3762_s30  ;;  %p2469_p8 = pneg %p2969_p7 }
  0x8d   : > { %s112_s18 = ssub.s32 %s103_s28, %s111_s6 }
  0x8e   : > { %s312_s27 = sadd.s32 %s1898_s15, %s306_s29  ;;  %p3007_p4 = scmp.eq.s32.totalorder %s112_s18, 0 }
  0x8f   : > { %s1824_s21 = sshll.u32 %s312_s27, 6  ;;  %s2472_s15 = scalar_lea.hbm %s3701_s2, 4096 }
  0x90   : > { %s3005_s17 = scalar_lea.hbm %s3701_s2, %s1824_s21 }
  0x91   : > { %s2467_s29 = scalar_lea.hbm %s3005_s17, 1024  ;;  %p2473_p10 = scmp.lt.u32.totalorder %s3005_s17, %s3701_s2 }
  0x92   : > { %p2468_p6 = scmp.ne.s32.totalorder %s3005_s17, %s2467_s29  ;;  %p2474_p11 = scmp.lt.u32.totalorder %s2472_s15, %s2467_s29 }
  0x93   : > { %p2476_p3 = scmp.lt.u32.totalorder %s2467_s29, %s3005_s17 }
  0x94   : > { %p2470_p0 = pnand %p2469_p8, %p2468_p6  ;;  %p2475_p13 = por %p2474_p11, %p2473_p10 }
  0x96   : > { %p2471_p9 = pneg %p2470_p0  ;;  %p2477_p12 = por %p2476_p3, %p2475_p13 }
  0x98   : > { %p2478_p1 = pnand %p2477_p12, %p2471_p9 }
  0x9a   : > { %2481 = shalt.err (!%p2478_p1)
}
  0x9b   : > { %s2482_s30 = scalar_lea.vmem %s2991_s11, 1024  ;;  %s2695_s21 = smov [#allocation6]  }
  0x9c   : > { %p2483_p6 = scmp.ne.s32.totalorder %s2991_s11, %s2482_s30  ;;  %s2487_s18 = sshll.u32 %s2695_s21, 4  ;;  %s2488_s18 = int_to_ptr.vmem [resolvable:$false] %s2487_s18 }
  0x9d   : > { %s2489_s14 = scalar_lea.vmem %s2488_s18, 2048  ;;  %p2490_p2 = scmp.lt.s32.totalorder %s2991_s11, %s2488_s18 }
  0x9e   : > { %p2485_p0 = pnand %p2483_p6, %p2469_p8  ;;  %p2491_p10 = scmp.lt.s32.totalorder %s2489_s14, %s2482_s30 }
  0xa0   : > { %p2486_p5 = pneg %p2485_p0  ;;  %p2492_p11 = por %p2491_p10, %p2490_p2 }
  0xa2   : > { %p2493_p13 = pnand %p2492_p11, %p2486_p5 }
  0xa4   : > { %2496 = shalt.err (!%p2493_p13)
}
  0xa5   : > { %s2696_s0 = smov 128   ;;  %s3763_s29 = smov 4  }
  0xa6   : > { %s3764_s28 = smov 64   ;;  %s3765_s6 = sadd.s32 1, %s2655_s23 }
  0xa7   : > { %2154 = dma.hbm_to_vmem [thread:$0]  (!%p2969_p7), %s3005_s17, 1024, %s2991_s11, %s3013_s20, %s2696_s0, %s3764_s28, %s3763_s29  }
  0xa8   : > { %s3048_s19 = scalar_select %p3007_p4, %s2655_s23, %s3765_s6  }
  0xa9   : > { %p3766_p5 = scmp.ne.s32.totalorder %s3760_s8, 0  ;;  %p3767_p2 = scmp.lt.s32.totalorder %s2687_s9, 4 }
  0xaa   : > { %s325_s11 = sand.u32 1, %s2687_s9   ;;  %s329_s4 = scalar_lea.vmem [#allocation9], %s3000_s7 }
  0xab   : > { %s2131_s15 = scalar_select %p3766_p5, [#allocation4], [#allocation16] }
  0xac   : > { %s3820_s24 = smov (!%p3766_p5, %s2938_s24), 0  ;;  %p3768_p8 = pmov %p3767_p2 }
  0xad   : > { %s3822_s15 = smov (!%p3767_p2, %s2131_s15), [#allocation18]  ;;  %p3769_p9 = pmov %p3767_p2 }
  0xae   : > { %s3824_s24 = smov (!%p3768_p8, %s3820_s24), 0  ;;  %s344_s17 = sshll.u32 %s329_s4, 4  ;;  %s3069_s17 = int_to_ptr.vmem [resolvable:$true] %s344_s17 }
  0xaf   : > { %p3063_p3 = pnand %p3769_p9, %p3766_p5  ;;  %s337_s20 = sld [smem:[%s3822_s15 + %s3824_s24]] }
  0xb0   : > { %s3076_s8 = scalar_lea.sflag [#allocation10], %s325_s11  ;;  %s2502_s0 = scalar_lea.hbm %s3702_s3, 2048 }
  0xb1   : > { %p2499_p4 = pneg %p3063_p3 }
  0xb5   : > { %s1899_s27 = sshll.u32 %s337_s20, 10 }
  0xb6   : > { %s3074_s18 = scalar_lea.hbm %s3702_s3, %s1899_s27 }
  0xb7   : > { %s2497_s14 = scalar_lea.hbm %s3074_s18, 1024  ;;  %p2503_p6 = scmp.lt.u32.totalorder %s3074_s18, %s3702_s3 }
  0xb8   : > { %p2498_p7 = scmp.ne.s32.totalorder %s3074_s18, %s2497_s14  ;;  %p2504_p0 = scmp.lt.u32.totalorder %s2502_s0, %s2497_s14 }
  0xb9   : > { %p2506_p11 = scmp.lt.u32.totalorder %s2497_s14, %s3074_s18 }
  0xba   : > { %p2500_p12 = pnand %p2499_p4, %p2498_p7  ;;  %p2505_p10 = por %p2504_p0, %p2503_p6 }
  0xbc   : > { %p2501_p1 = pneg %p2500_p12  ;;  %p2507_p13 = por %p2506_p11, %p2505_p10 }
  0xbe   : > { %p2508_p5 = pnand %p2507_p13, %p2501_p1 }
  0xc0   : > { %2511 = shalt.err (!%p2508_p5)
}
  0xc1   : > { %s2512_s20 = scalar_lea.vmem %s3069_s17, 1024  ;;  %s2697_s11 = smov [#allocation9]  }
  0xc2   : > { %p2513_p2 = scmp.ne.s32.totalorder %s3069_s17, %s2512_s20  ;;  %s2517_s4 = sshll.u32 %s2697_s11, 4  ;;  %s2518_s4 = int_to_ptr.vmem [resolvable:$false] %s2517_s4 }
  0xc3   : > { %s2519_s27 = scalar_lea.vmem %s2518_s4, 2048  ;;  %p2520_p7 = scmp.lt.s32.totalorder %s3069_s17, %s2518_s4 }
  0xc4   : > { %p2515_p8 = pnand %p2513_p2, %p2499_p4  ;;  %p2521_p12 = scmp.lt.s32.totalorder %s2519_s27, %s2512_s20 }
  0xc6   : > { %p2516_p9 = pneg %p2515_p8  ;;  %p2522_p6 = por %p2521_p12, %p2520_p7 }
  0xc8   : > { %p2523_p0 = pnand %p2522_p6, %p2516_p9 }
  0xca   : > { %2526 = shalt.err (!%p2523_p0)
}
  0xcb   : > { %2159 = dma.hbm_to_vmem [thread:$0]  (!%p3063_p3), %s3074_s18, 1024, %s3069_s17, %s3076_s8, %s3764_s28, %s3764_s28, %s3763_s29  }
  0xcc   : > { %p3771_p4 = scmp.ne.s32.totalorder %s3750_s16, 0 }
  0xcd   : > { %s358_s30 = sand.u32 (!%p3771_p4), 1, %s2663_s25   ;;  %p3772_p1 = scmp.ne.s32.totalorder (!%p3771_p4), %s3744_s12, 0 }
  0xce   : > { %356 = sbr.rel (%p3771_p4) target bundleno = 1683 (0x693), region = 44  ;;  %s1830_s21 = sshll.u32 (!%p3771_p4), %s358_s30, 6 }
  0xcf   : > { %s359_s14 = scalar_lea.sflag (!%p3771_p4), [#allocation7], %s358_s30  ;;  %s3110_s7 = scalar_lea.vmem (!%p3771_p4), [#allocation6], %s1830_s21 }
  0xd5   : > { %2614 = dma.done.wait (%p3772_p1), %s359_s14, 1024  }
  0xd6   : > { %2616 = vsyncadd (%p3772_p1), %s359_s14, 4294966272  ;;  %s367_s5 = sand.u32 1, %s2830_s10   ;;  %s369_s29 = sand.u32 1, %s2651_s22  }
  0xd7   : > { %s1831_s28 = sshll.u32 %s369_s29, 6  ;;  %s368_s16 = scalar_lea.sflag [#allocation10], %s367_s5 }
  0xd8   : > { %s3118_s17 = scalar_lea.vmem [#allocation9], %s1831_s28  ;;  %p3773_p3 = scmp.ne.s32.totalorder %s3745_s13, 0 }
  0xda   : > { %2618 = dma.done.wait (%p3773_p3), %s368_s16, 1024  }
  0xdb   : > { %2620 = vsyncadd (%p3773_p3), %s368_s16, 4294966272  ;;  %p3774_p10 = scmp.eq.s32.totalorder %s2830_s10, 0 }
  0xdd   : > { %2622 = dma.done.wait (%p3774_p10), [#allocation10], 1024   ;;  %p3775_p11 = pmov %p3774_p10 }
  0xde   : > { %p3776_p13 = pmov %p3774_p10 }
  0xdf   : > { %2624 = vsyncadd (%p3775_p11), [#allocation10], 4294966272 }
  0xe0   : > { %2626 = dma.done.wait (%p3776_p13), [#allocation13], 1024   ;;  %p3777_p5 = pmov %p3774_p10 }
  0xe1   : > { %s410_s12 = sand.u32 1, %s2639_s1   ;;  %s3778_s13 = sld [smem:[#allocation27_spill]] }
  0xe2   : > { %2628 = vsyncadd (%p3777_p5), [#allocation13], 4294966272  ;;  %s1834_s18 = sshll.u32 %s410_s12, 6 }
  0xe3   : > { %s3135_s8 = scalar_lea.vmem [#allocation14], %s1834_s18 }
  0xe7   : > { %p1835_p2 = scmp.ne.s32.totalorder %s3778_s13, 0 }
  0xe8   : > { %v2698_v0 = vmov (!%p1835_p2), 0.0  }
  0xe9   : > { %436 = sbr.rel (%p1835_p2) target bundleno = 241 (0xf1), region = 64  ;;  %437 = vst [vmem:[#allocation2] sm:$0xff] (!%p1835_p2), %v2698_v0  ;;  %438 = vst [vmem:[#allocation2 + $0x8] sm:$0xff] (!%p1835_p2), %v2698_v0 }
  0xea   : > { %439 = vst [vmem:[#allocation2 + $0x10] sm:$0xff] (!%p1835_p2), %v2698_v0  ;;  %440 = vst [vmem:[#allocation2 + $0x18] sm:$0xff] (!%p1835_p2), %v2698_v0 }
  0xeb   : > { %441 = vst [vmem:[#allocation2 + $0x20] sm:$0xff] (!%p1835_p2), %v2698_v0  ;;  %442 = vst [vmem:[#allocation2 + $0x28] sm:$0xff] (!%p1835_p2), %v2698_v0 }
  0xec   : > { %443 = vst [vmem:[#allocation2 + $0x30] sm:$0xff] (!%p1835_p2), %v2698_v0  ;;  %444 = vst [vmem:[#allocation2 + $0x38] sm:$0xff] (!%p1835_p2), %v2698_v0 }
  0xed   : > { %445 = vst [vmem:[#allocation2 + $0x40] sm:$0xff] (!%p1835_p2), %v2698_v0  ;;  %446 = vst [vmem:[#allocation2 + $0x48] sm:$0xff] (!%p1835_p2), %v2698_v0 }
  0xee   : > { %447 = vst [vmem:[#allocation2 + $0x50] sm:$0xff] (!%p1835_p2), %v2698_v0  ;;  %448 = vst [vmem:[#allocation2 + $0x58] sm:$0xff] (!%p1835_p2), %v2698_v0 }
  0xef   : > { %449 = vst [vmem:[#allocation2 + $0x60] sm:$0xff] (!%p1835_p2), %v2698_v0  ;;  %450 = vst [vmem:[#allocation2 + $0x68] sm:$0xff] (!%p1835_p2), %v2698_v0 }
  0xf0   : > { %451 = vst [vmem:[#allocation2 + $0x70] sm:$0xff] %v2698_v0  ;;  %452 = vst [vmem:[#allocation2 + $0x78] sm:$0xff] %v2698_v0 }
  0xf1 PF: > { %s3779_s10 = sld [smem:[#allocation28_spill]]  ;;  %s3780_s0 = sld [smem:[#allocation27_spill]] }
  0xf7   : > { %s453_s24 = sld [smem:[#allocation5 + %s3779_s10]] }
  0xfd   : > { %p1836_p8 = scmp.ge.s32.totalorder %s3780_s0, %s453_s24 }
  0xfe   : > { %v2293_v1 = vld [vmem:[%s3118_s17] sm:$0xff] (!%p1836_p8)   ;;  %v2294_v2 = vld [vmem:[%s3118_s17 + $0x8] sm:$0xff] (!%p1836_p8)   ;;  %v2295_v3 = vld [vmem:[%s3118_s17 + $0x10] sm:$0xff] (!%p1836_p8)  }
  0xff   : > { %457 = sbr.rel (%p1836_p8) target bundleno = 513 (0x201), region = 68  ;;  %2012 = vmatprep.subr.bf16.mxu0 (!%p1836_p8), %v2293_v1  ;;  %2108 = vmatprep.subr.bf16.mxu1 (!%p1836_p8), %v2293_v1  ;;  %v2296_v4 = vld [vmem:[%s3118_s17 + $0x18] sm:$0xff] (!%p1836_p8)   ;;  %v2301_v5 = vld [vmem:[%s3110_s7] sm:$0xff] (!%p1836_p8)   ;;  %v2298_v8 = vld [vmem:[%s3118_s17 + $0x28] sm:$0xff] (!%p1836_p8)  }
 0x100   : > { %2013 = vmatpush3.bf16.msra.mxu0 (!%p1836_p8), %v2293_v1  ;;  %2116 = vmatpush3.bf16.msra.mxu1 (!%p1836_p8), %v2293_v1  ;;  %v2302_v6 = vld [vmem:[%s3110_s7 + $0x20] sm:$0xff] (!%p1836_p8)   ;;  %v2299_v9 = vld [vmem:[%s3118_s17 + $0x30] sm:$0xff] (!%p1836_p8)   ;;  %v2300_v10 = vld [vmem:[%s3118_s17 + $0x38] sm:$0xff] (!%p1836_p8)  }
 0x101   : > { %2014 = vmatprep.subr.bf16.mxu0 (!%p1836_p8), %v2294_v2  ;;  %2109 = vmatprep.subr.bf16.mxu1 (!%p1836_p8), %v2294_v2  ;;  %v2297_v7 = vld [vmem:[%s3118_s17 + $0x20] sm:$0xff] (!%p1836_p8)   ;;  %v2303_v11 = vld [vmem:[%s3110_s7 + $0x8] sm:$0xff] (!%p1836_p8)   ;;  %v2305_v13 = vld [vmem:[%s3110_s7 + $0x10] sm:$0xff] (!%p1836_p8)  }
 0x102   : > { %2028 = vmatprep.mubr.bf16.mxu0 (!%p1836_p8), %v2301_v5  ;;  %2036 = vmatprep.mubr.bf16.mxu1 (!%p1836_p8), %v2302_v6  ;;  %v2304_v12 = vld [vmem:[%s3110_s7 + $0x28] sm:$0xff] (!%p1836_p8)   ;;  %v2306_v14 = vld [vmem:[%s3110_s7 + $0x30] sm:$0xff] (!%p1836_p8)   ;;  %v2307_v15 = vld [vmem:[%s3110_s7 + $0x18] sm:$0xff] (!%p1836_p8)  }
 0x103   : > { %v2308_v16 = vld [vmem:[%s3110_s7 + $0x38] sm:$0xff] (!%p1836_p8)   ;;  %v460_v17 = vld [vmem:[#allocation2 + $0x10] sm:$0xff] (!%p1836_p8)  ;;  %v458_v19 = vld [vmem:[#allocation2] sm:$0xff] (!%p1836_p8) }
 0x104   : > { %2015 = vmatpush3.bf16.msra.mxu0 (!%p1836_p8), %v2294_v2  ;;  %2117 = vmatpush3.bf16.msra.mxu1 (!%p1836_p8), %v2294_v2  ;;  %v468_v18 = vld [vmem:[#allocation2 + $0x50] sm:$0xff] (!%p1836_p8)  ;;  %v466_v20 = vld [vmem:[#allocation2 + $0x40] sm:$0xff] (!%p1836_p8)  ;;  %v461_v23 = vld [vmem:[#allocation2 + $0x18] sm:$0xff] (!%p1836_p8) }
 0x105   : > { %2016 = vmatprep.subr.bf16.mxu0 (!%p1836_p8), %v2295_v3  ;;  %2110 = vmatprep.subr.bf16.mxu1 (!%p1836_p8), %v2295_v3  ;;  %v469_v24 = vld [vmem:[#allocation2 + $0x58] sm:$0xff] (!%p1836_p8)  ;;  %v459_v29 = vld [vmem:[#allocation2 + $0x8] sm:$0xff] (!%p1836_p8)  ;;  %v464_v41 = vld [vmem:[#allocation2 + $0x30] sm:$0xff] (!%p1836_p8) }
 0x106   : > { %v467_v30 = vld [vmem:[#allocation2 + $0x48] sm:$0xff]  ;;  %v472_v42 = vld [vmem:[#allocation2 + $0x70] sm:$0xff]  ;;  %v462_v43 = vld [vmem:[#allocation2 + $0x20] sm:$0xff] }
 0x107   : > { %v470_v44 = vld [vmem:[#allocation2 + $0x60] sm:$0xff]  ;;  %v465_v47 = vld [vmem:[#allocation2 + $0x38] sm:$0xff]  ;;  %v463_v53 = vld [vmem:[#allocation2 + $0x28] sm:$0xff] }
 0x108   : > { %2017 = vmatpush3.bf16.msra.mxu0 %v2295_v3  ;;  %2118 = vmatpush3.bf16.msra.mxu1 %v2295_v3  ;;  %v473_v48 = vld [vmem:[#allocation2 + $0x78] sm:$0xff]  ;;  %v471_v54 = vld [vmem:[#allocation2 + $0x68] sm:$0xff] }
 0x109   : > { %2018 = vmatprep.subr.bf16.mxu0 %v2296_v4  ;;  %2111 = vmatprep.subr.bf16.mxu1 %v2296_v4 }
 0x10c   : > { %2019 = vmatpush3.bf16.msra.mxu0 %v2296_v4  ;;  %2119 = vmatpush3.bf16.msra.mxu1 %v2296_v4 }
 0x10d   : > { %2020 = vmatprep.subr.bf16.mxu0 %v2297_v7  ;;  %2112 = vmatprep.subr.bf16.mxu1 %v2297_v7 }
 0x110   : > { %2021 = vmatpush3.bf16.msra.mxu0 %v2297_v7  ;;  %2120 = vmatpush3.bf16.msra.mxu1 %v2297_v7 }
 0x111   : > { %2022 = vmatprep.subr.bf16.mxu0 %v2298_v8  ;;  %2113 = vmatprep.subr.bf16.mxu1 %v2298_v8 }
 0x114   : > { %2023 = vmatpush3.bf16.msra.mxu0 %v2298_v8  ;;  %2121 = vmatpush3.bf16.msra.mxu1 %v2298_v8 }
 0x115   : > { %2024 = vmatprep.subr.bf16.mxu0 %v2299_v9  ;;  %2114 = vmatprep.subr.bf16.mxu1 %v2299_v9 }
 0x118   : > { %2025 = vmatpush3.bf16.msra.mxu0 %v2299_v9  ;;  %2122 = vmatpush3.bf16.msra.mxu1 %v2299_v9 }
 0x119   : > { %2026 = vmatprep.subr.bf16.mxu0 %v2300_v10  ;;  %2115 = vmatprep.subr.bf16.mxu1 %v2300_v10 }
 0x11c   : > { %2027 = vmatpush3.bf16.msra.mxu0 %v2300_v10  ;;  %2123 = vmatpush3.bf16.msra.mxu1 %v2300_v10 }
 0x11f   : > { %2029 = vmatmul.mubr.bf16.vlgmr.msra.gmra.mrb[0].mxu0 %v2303_v11  ;;  %2037 = vmatmul.mubr.bf16.vlgmr.msra.gmra.mrb[0].mxu1 %v2304_v12 }
 0x120   : > { %2032 = vmatprep.mubr.bf16.mxu0 %v2305_v13  ;;  %2040 = vmatprep.mubr.bf16.mxu1 %v2306_v14 }
 0x127   : > { %2033 = vmatmul.mubr.bf16.gmra.mrb[4].mxu0 %v2307_v15  ;;  %2041 = vmatmul.mubr.bf16.gmra.mrb[4].mxu1 %v2308_v16 }
 0x1f2   : > { %v2030_v21 = vpop.f32.mrb[0].mxu0  ;;  %v2038_v22 = vpop.f32.mrb[0].mxu1 }
 0x1f3   : > { %v701_v25 = vadd.f32 %v2030_v21, %v460_v17  ;;  %v709_v26 = vadd.f32 %v2038_v22, %v468_v18  ;;  %v636_v27 = vpop.f32.mrb[1].mxu0  ;;  %v668_v28 = vpop.f32.mrb[1].mxu1 }
 0x1f4   : > { %v699_v31 = vadd.f32 %v636_v27, %v458_v19  ;;  %v707_v32 = vadd.f32 %v668_v28, %v466_v20  ;;  %v2031_v33 = vpop.f32.mrb[2].mxu0  ;;  %v2039_v34 = vpop.f32.mrb[2].mxu1 }
 0x1f5   : > { %717 = vst [vmem:[#allocation2 + $0x10] sm:$0xff] %v701_v25  ;;  %725 = vst [vmem:[#allocation2 + $0x50] sm:$0xff] %v709_v26  ;;  %v702_v35 = vadd.f32 %v2031_v33, %v461_v23  ;;  %v710_v36 = vadd.f32 %v2039_v34, %v469_v24  ;;  %v639_v37 = vpop.f32.mrb[3].mxu0  ;;  %v671_v38 = vpop.f32.mrb[3].mxu1 }
 0x1f6   : > { %715 = vst [vmem:[#allocation2] sm:$0xff] %v699_v31  ;;  %723 = vst [vmem:[#allocation2 + $0x40] sm:$0xff] %v707_v32  ;;  %v700_v39 = vadd.f32 %v639_v37, %v459_v29  ;;  %v708_v40 = vadd.f32 %v671_v38, %v467_v30 }
 0x1f7   : > { %718 = vst [vmem:[#allocation2 + $0x18] sm:$0xff] %v702_v35  ;;  %726 = vst [vmem:[#allocation2 + $0x58] sm:$0xff] %v710_v36 }
 0x1f8   : > { %716 = vst [vmem:[#allocation2 + $0x8] sm:$0xff] %v700_v39  ;;  %724 = vst [vmem:[#allocation2 + $0x48] sm:$0xff] %v708_v40 }
 0x1fa   : > { %v2034_v45 = vpop.f32.mrb[4].mxu0  ;;  %v2042_v46 = vpop.f32.mrb[4].mxu1 }
 0x1fb   : > { %v705_v49 = vadd.f32 %v2034_v45, %v464_v41  ;;  %v713_v50 = vadd.f32 %v2042_v46, %v472_v42  ;;  %v652_v51 = vpop.f32.mrb[5].mxu0  ;;  %v684_v52 = vpop.f32.mrb[5].mxu1 }
 0x1fc   : > { %v703_v55 = vadd.f32 %v652_v51, %v462_v43  ;;  %v711_v56 = vadd.f32 %v684_v52, %v470_v44  ;;  %v2035_v57 = vpop.f32.mrb[6].mxu0  ;;  %v2043_v58 = vpop.f32.mrb[6].mxu1 }
 0x1fd   : > { %721 = vst [vmem:[#allocation2 + $0x30] sm:$0xff] %v705_v49  ;;  %729 = vst [vmem:[#allocation2 + $0x70] sm:$0xff] %v713_v50  ;;  %v706_v59 = vadd.f32 %v2035_v57, %v465_v47  ;;  %v714_v60 = vadd.f32 %v2043_v58, %v473_v48  ;;  %v655_v61 = vpop.f32.mrb[7].mxu0  ;;  %v687_v62 = vpop.f32.mrb[7].mxu1 }
 0x1fe   : > { %719 = vst [vmem:[#allocation2 + $0x20] sm:$0xff] %v703_v55  ;;  %727 = vst [vmem:[#allocation2 + $0x60] sm:$0xff] %v711_v56  ;;  %v704_v63 = vadd.f32 %v655_v61, %v463_v53  ;;  %v712_v0 = vadd.f32 %v687_v62, %v471_v54 }
 0x1ff   : > { %722 = vst [vmem:[#allocation2 + $0x38] sm:$0xff] %v706_v59  ;;  %730 = vst [vmem:[#allocation2 + $0x78] sm:$0xff] %v714_v60 }
 0x200   : > { %720 = vst [vmem:[#allocation2 + $0x28] sm:$0xff] %v704_v63  ;;  %728 = vst [vmem:[#allocation2 + $0x68] sm:$0xff] %v712_v0 }
 0x201 PF: > { %s3781_s6 = sld [smem:[#allocation27_spill]] }
 0x207   : > { %p1853_p9 = scmp.ne.s32.totalorder %s3781_s6, 1 }
 0x208   : > { %v2309_v1 = vld [vmem:[#allocation11] sm:$0xff] (!%p1853_p9)   ;;  %v2310_v2 = vld [vmem:[#allocation11 + $0x8] sm:$0xff] (!%p1853_p9)   ;;  %v2311_v3 = vld [vmem:[#allocation11 + $0x10] sm:$0xff] (!%p1853_p9)   ;;  %s3782_s11 = sld [smem:[#allocation39_spill]] (!%p1853_p9)  ;;  %s3783_s5 = sld [smem:[#allocation40_spill]] (!%p1853_p9) }
 0x209   : > { %734 = sbr.rel (%p1853_p9) target bundleno = 1655 (0x677), region = 72  ;;  %2044 = vmatprep.subr.bf16.mxu0 (!%p1853_p9), %v2309_v1  ;;  %v2312_v4 = vld [vmem:[#allocation11 + $0x18] sm:$0xff] (!%p1853_p9)   ;;  %v739_v5 = vld [vmem:[#allocation2] sm:$0xff] (!%p1853_p9)  ;;  %v740_v6 = vld [vmem:[#allocation2 + $0x8] sm:$0xff] (!%p1853_p9) }
 0x20a   : > { %2045 = vmatpush3.bf16.msra.mxu0 (!%p1853_p9), %v2309_v1  ;;  %v755_v7 = vpack.c.bf16 (!%p1853_p9), %v740_v6, %v739_v5  ;;  %v2313_v8 = vld [vmem:[#allocation11 + $0x20] sm:$0xff] (!%p1853_p9)   ;;  %v2314_v9 = vld [vmem:[#allocation11 + $0x28] sm:$0xff] (!%p1853_p9)   ;;  %v2315_v10 = vld [vmem:[#allocation11 + $0x30] sm:$0xff] (!%p1853_p9)  }
 0x20b   : > { %2046 = vmatprep.subr.bf16.mxu0 (!%p1853_p9), %v2310_v2  ;;  %v2316_v11 = vld [vmem:[#allocation11 + $0x38] sm:$0xff] (!%p1853_p9)   ;;  %v741_v12 = vld [vmem:[#allocation2 + $0x10] sm:$0xff] (!%p1853_p9)  ;;  %v743_v14 = vld [vmem:[#allocation2 + $0x20] sm:$0xff] (!%p1853_p9) }
 0x20c   : > { %2060 = vmatprep.mubr.bf16.mxu0 (!%p1853_p9), %v755_v7  ;;  %v742_v13 = vld [vmem:[#allocation2 + $0x18] sm:$0xff] (!%p1853_p9)  ;;  %v744_v15 = vld [vmem:[#allocation2 + $0x28] sm:$0xff] (!%p1853_p9)  ;;  %v745_v18 = vld [vmem:[#allocation2 + $0x30] sm:$0xff] (!%p1853_p9) }
 0x20d   : > { %v756_v16 = vpack.c.bf16 (!%p1853_p9), %v742_v13, %v741_v12  ;;  %v757_v17 = vpack.c.bf16 (!%p1853_p9), %v744_v15, %v743_v14  ;;  %v746_v19 = vld [vmem:[#allocation2 + $0x38] sm:$0xff] (!%p1853_p9)  ;;  %v747_v20 = vld [vmem:[#allocation2 + $0x40] sm:$0xff] (!%p1853_p9)  ;;  %v748_v21 = vld [vmem:[#allocation2 + $0x48] sm:$0xff] (!%p1853_p9) }
 0x20e   : > { %2047 = vmatpush3.bf16.msra.mxu0 (!%p1853_p9), %v2310_v2  ;;  %v758_v22 = vpack.c.bf16 (!%p1853_p9), %v746_v19, %v745_v18  ;;  %v759_v23 = vpack.c.bf16 (!%p1853_p9), %v748_v21, %v747_v20  ;;  %v749_v24 = vld [vmem:[#allocation2 + $0x50] sm:$0xff] (!%p1853_p9)  ;;  %v750_v25 = vld [vmem:[#allocation2 + $0x58] sm:$0xff] (!%p1853_p9)  ;;  %v751_v26 = vld [vmem:[#allocation2 + $0x60] sm:$0xff] (!%p1853_p9)  ;;  %v944_v19 = vlaneseq (!%p1853_p9) }
 0x20f   : > { %2048 = vmatprep.subr.bf16.mxu0 (!%p1853_p9), %v2311_v3  ;;  %v752_v27 = vld [vmem:[#allocation2 + $0x68] sm:$0xff] (!%p1853_p9)  ;;  %v760_v28 = vpack.c.bf16 (!%p1853_p9), %v750_v25, %v749_v24  ;;  %v753_v30 = vld [vmem:[#allocation2 + $0x70] sm:$0xff] (!%p1853_p9)  ;;  %v754_v31 = vld [vmem:[#allocation2 + $0x78] sm:$0xff] (!%p1853_p9)  ;;  %v2699_v25 = vmov (!%p1853_p9), 0.0  }
 0x210   : > { %v761_v29 = vpack.c.bf16 %v752_v27, %v751_v26  ;;  %v762_v32 = vpack.c.bf16 %v754_v31, %v753_v30  ;;  %v1854_v33 = vld [vmem:[%s3782_s11] ss:$0 sm:$0xff]  ;;  %v2317_v18 = vld [vmem:[#allocation12] sm:$0xff]   ;;  %v945_v20 = vand.u32 127, %v944_v19 }
 0x211   : > { %2076 = vmatprep.subr.bf16.mxu1 %v2317_v18 }
 0x212   : > { %2049 = vmatpush3.bf16.msra.mxu0 %v2311_v3  ;;  %2077 = vmatpush3.bf16.msra.mxu1 %v2317_v18  ;;  %vm946_vm0 = vcmp.lt.s32.totalorder %v945_v20, 32 }
 0x213   : > { %2050 = vmatprep.subr.bf16.mxu0 %v2312_v4  ;;  %v3240_v26 = vsel %vm946_vm0, 1.0, %v2699_v25 }
 0x216   : > { %2051 = vmatpush3.bf16.msra.mxu0 %v2312_v4 }
 0x217   : > { %2052 = vmatprep.subr.bf16.mxu0 %v2313_v8 }
 0x21a   : > { %2053 = vmatpush3.bf16.msra.mxu0 %v2313_v8 }
 0x21b   : > { %2054 = vmatprep.subr.bf16.mxu0 %v2314_v9 }
 0x21e   : > { %2055 = vmatpush3.bf16.msra.mxu0 %v2314_v9 }
 0x21f   : > { %2056 = vmatprep.subr.bf16.mxu0 %v2315_v10 }
 0x222   : > { %2057 = vmatpush3.bf16.msra.mxu0 %v2315_v10 }
 0x223   : > { %2058 = vmatprep.subr.bf16.mxu0 %v2316_v11 }
 0x226   : > { %2059 = vmatpush3.bf16.msra.mxu0 %v2316_v11 }
 0x229   : > { %2061 = vmatmul.mubr.bf16.vlgmr.msra.gmra.mrb[0].mxu0 %v756_v16 }
 0x22a   : > { %2064 = vmatprep.mubr.bf16.mxu0 %v757_v17 }
 0x231   : > { %2065 = vmatmul.mubr.bf16.gmra.mrb[4].mxu0 %v758_v22 }
 0x232   : > { %2068 = vmatprep.mubr.bf16.mxu0 %v759_v23 }
 0x239   : > { %2069 = vmatmul.mubr.bf16.gmra.mrb[8].mxu0 %v760_v28 }
 0x23a   : > { %2072 = vmatprep.mubr.bf16.mxu0 %v761_v29 }
 0x241   : > { %2073 = vmatmul.mubr.bf16.gmra.mrb[12].mxu0 %v762_v32 }
 0x2fc   : > { %v2062_v34 = vpop.f32.mrb[0].mxu0 }
 0x2fd   : > { %v3160_v35 = vadd.f32 %v2062_v34, %v1854_v33  ;;  %v865_v36 = vpop.f32.mrb[1].mxu0 }
 0x2fe   : > { %v3162_v37 = vadd.f32 %v1854_v33, %v865_v36  ;;  %v2063_v38 = vpop.f32.mrb[2].mxu0 }
 0x2ff   : > { %v930_v39 = vmax.f32 %v3160_v35, 0.0  ;;  %v3165_v40 = vadd.f32 %v2063_v38, %v1854_v33  ;;  %v868_v41 = vpop.f32.mrb[3].mxu0 }
 0x300   : > { %v928_v42 = vmax.f32 %v3162_v37, 0.0  ;;  %v3168_v43 = vadd.f32 %v1854_v33, %v868_v41 }
 0x301   : > { %953 = vadd.xlane.f32.xlu1 %v930_v39  ;;  %v931_v44 = vmax.f32 %v3165_v40, 0.0 }
 0x302   : > { %949 = vadd.xlane.f32.xlu0 %v928_v42  ;;  %v929_v45 = vmax.f32 %v3168_v43, 0.0 }
 0x304   : > { %v2066_v46 = vpop.f32.mrb[4].mxu0 }
 0x305   : > { %955 = vadd.xlane.f32.xlu1 %v931_v44  ;;  %v881_v47 = vpop.f32.mrb[5].mxu0  ;;  %v3182_v51 = vadd.f32 %v2066_v46, %v1854_v33 }
 0x306   : > { %v3178_v48 = vadd.f32 %v1854_v33, %v881_v47  ;;  %v2067_v49 = vpop.f32.mrb[6].mxu0  ;;  %951 = vadd.xlane.f32.xlu0 %v929_v45 }
 0x307   : > { %v884_v50 = vpop.f32.mrb[7].mxu0  ;;  %v3187_v54 = vadd.f32 %v2067_v49, %v1854_v33  ;;  %v934_v56 = vmax.f32 %v3182_v51, 0.0 }
 0x308   : > { %v932_v52 = vmax.f32 %v3178_v48, 0.0  ;;  %v3185_v53 = vadd.f32 %v1854_v33, %v884_v50 }
 0x309   : > { %v935_v59 = vmax.f32 %v3187_v54, 0.0 }
 0x30a   : > { %v933_v55 = vmax.f32 %v3185_v53, 0.0  ;;  %957 = vadd.xlane.f32.xlu0 %v932_v52 }
 0x30c   : > { %v2070_v57 = vpop.f32.mrb[8].mxu0  ;;  %959 = vadd.xlane.f32.xlu1 %v933_v55 }
 0x30d   : > { %v897_v58 = vpop.f32.mrb[9].mxu0  ;;  %v3200_v63 = vadd.f32 %v2070_v57, %v1854_v33 }
 0x30e   : > { %v3196_v60 = vadd.f32 %v1854_v33, %v897_v58  ;;  %v2071_v61 = vpop.f32.mrb[10].mxu0  ;;  %961 = vadd.xlane.f32.xlu0 %v934_v56 }
 0x30f   : > { %v900_v62 = vpop.f32.mrb[11].mxu0  ;;  %v3207_v2 = vadd.f32 %v2071_v61, %v1854_v33  ;;  %v938_v4 = vmax.f32 %v3200_v63, 0.0 }
 0x310   : > { %v936_v0 = vmax.f32 %v3196_v60, 0.0  ;;  %v3203_v1 = vadd.f32 %v1854_v33, %v900_v62  ;;  %963 = vadd.xlane.f32.xlu1 %v935_v59 }
 0x311   : > { %v939_v7 = vmax.f32 %v3207_v2, 0.0 }
 0x312   : > { %v937_v3 = vmax.f32 %v3203_v1, 0.0  ;;  %965 = vadd.xlane.f32.xlu0 %v936_v0 }
 0x314   : > { %v2074_v5 = vpop.f32.mrb[12].mxu0  ;;  %967 = vadd.xlane.f32.xlu1 %v937_v3 }
 0x315   : > { %v913_v6 = vpop.f32.mrb[13].mxu0  ;;  %v3220_v11 = vadd.f32 %v2074_v5, %v1854_v33 }
 0x316   : > { %v3216_v8 = vadd.f32 %v1854_v33, %v913_v6  ;;  %v2075_v9 = vpop.f32.mrb[14].mxu0  ;;  %969 = vadd.xlane.f32.xlu0 %v938_v4 }
 0x317   : > { %v916_v10 = vpop.f32.mrb[15].mxu0  ;;  %v3227_v14 = vadd.f32 %v2075_v9, %v1854_v33  ;;  %v942_v16 = vmax.f32 %v3220_v11, 0.0 }
 0x318   : > { %v940_v12 = vmax.f32 %v3216_v8, 0.0  ;;  %v3223_v13 = vadd.f32 %v1854_v33, %v916_v10  ;;  %971 = vadd.xlane.f32.xlu1 %v939_v7  ;;  %v2319_v8 = vld [vmem:[#allocation12 + $0x10] sm:$0xff]  }
 0x319   : > { %v943_v17 = vmax.f32 %v3227_v14, 0.0  ;;  %v2321_v14 = vld [vmem:[#allocation12 + $0x20] sm:$0xff]  }
 0x31a   : > { %v941_v15 = vmax.f32 %v3223_v13, 0.0  ;;  %973 = vadd.xlane.f32.xlu0 %v940_v12 }
 0x31c   : > { %975 = vadd.xlane.f32.xlu1 %v941_v15 }
 0x31e   : > { %977 = vadd.xlane.f32.xlu0 %v942_v16 }
 0x320   : > { %979 = vadd.xlane.f32.xlu1 %v943_v17 }
 0x38e   : > { %v954_v21 = vpop.xlane.xlu1 %953 }
 0x38f   : > { %v983_v22 = vmul.f32 0.03125, %v954_v21  ;;  %v950_v23 = vpop.xlane.xlu0 %949 }
 0x390   : > { %v981_v24 = vmul.f32 0.03125, %v950_v23 }
 0x391   : > { %v999_v27 = vsub.f32 %v930_v39, %v983_v22 }
 0x392   : > { %v997_v28 = vsub.f32 %v928_v42, %v981_v24  ;;  %v956_v29 = vpop.xlane.xlu1 %955 }
 0x393   : > { %v984_v30 = vmul.f32 0.03125, %v956_v29  ;;  %v952_v31 = vpop.xlane.xlu0 %951  ;;  %v3256_v38 = vmul.f32 %v3240_v26, %v999_v27  ;;  %v2318_v27 = vld [vmem:[#allocation12 + $0x8] sm:$0xff]  }
 0x394   : > { %v982_v32 = vmul.f32 0.03125, %v952_v31  ;;  %v3247_v33 = vmul.f32 %v3240_v26, %v997_v28  ;;  %2078 = vmatprep.subr.bf16.mxu1 %v2318_v27 }
 0x395   : > { %v1000_v34 = vsub.f32 %v931_v44, %v984_v30  ;;  %v1031_v44 = vmul.f32 %v3256_v38, %v3256_v38  ;;  %2079 = vmatpush3.bf16.msra.mxu1 %v2318_v27 }
 0x396   : > { %v998_v36 = vsub.f32 %v929_v45, %v982_v32  ;;  %v1029_v35 = vmul.f32 %v3247_v33, %v3247_v33  ;;  %2080 = vmatprep.subr.bf16.mxu1 %v2319_v8 }
 0x397   : > { %v958_v37 = vpop.xlane.xlu0 %957  ;;  %v3262_v46 = vmul.f32 %v3240_v26, %v1000_v34 }
 0x398   : > { %v985_v39 = vmul.f32 0.03125, %v958_v37  ;;  %1045 = vadd.xlane.f32.xlu0 %v1029_v35  ;;  %v3259_v41 = vmul.f32 %v3240_v26, %v998_v36 }
 0x399   : > { %v960_v42 = vpop.xlane.xlu1 %959  ;;  %v1032_v48 = vmul.f32 %v3262_v46, %v3262_v46  ;;  %2081 = vmatpush3.bf16.msra.mxu1 %v2319_v8 }
 0x39a   : > { %v1001_v40 = vsub.f32 %v932_v52, %v985_v39  ;;  %v986_v43 = vmul.f32 0.03125, %v960_v42  ;;  %v1030_v45 = vmul.f32 %v3259_v41, %v3259_v41 }
 0x39b   : > { %v962_v47 = vpop.xlane.xlu0 %961 }
 0x39c   : > { %v1002_v49 = vsub.f32 %v933_v55, %v986_v43  ;;  %v987_v50 = vmul.f32 0.03125, %v962_v47  ;;  %1049 = vadd.xlane.f32.xlu0 %v1031_v44  ;;  %1047 = vadd.xlane.f32.xlu1 %v1030_v45  ;;  %v3273_v57 = vmul.f32 %v3240_v26, %v1001_v40  ;;  %v2320_v45 = vld [vmem:[#allocation12 + $0x18] sm:$0xff]  }
 0x39d   : > { %v964_v58 = vpop.xlane.xlu1 %963  ;;  %2082 = vmatprep.subr.bf16.mxu1 %v2320_v45 }
 0x39e   : > { %v1003_v52 = vsub.f32 %v934_v56, %v987_v50  ;;  %v988_v61 = vmul.f32 0.03125, %v964_v58  ;;  %v1033_v62 = vmul.f32 %v3273_v57, %v3273_v57  ;;  %v3282_v53 = vmul.f32 %v3240_v26, %v1002_v49  ;;  %2083 = vmatpush3.bf16.msra.mxu1 %v2320_v45  ;;  %v2322_v49 = vld [vmem:[#allocation12 + $0x28] sm:$0xff]   ;;  %v2323_v50 = vld [vmem:[#allocation12 + $0x30] sm:$0xff]   ;;  %v2324_v58 = vld [vmem:[#allocation12 + $0x38] sm:$0xff]  }
 0x39f   : > { %v966_v55 = vpop.xlane.xlu0 %965  ;;  %2084 = vmatprep.subr.bf16.mxu1 %v2321_v14 }
 0x3a0   : > { %v1004_v5 = vsub.f32 %v935_v59, %v988_v61  ;;  %v989_v6 = vmul.f32 0.03125, %v966_v55  ;;  %1051 = vadd.xlane.f32.xlu1 %v1032_v48  ;;  %1053 = vadd.xlane.f32.xlu0 %v1033_v62  ;;  %v3287_v9 = vmul.f32 %v3240_v26, %v1003_v52  ;;  %v1034_v51 = vmul.f32 %v3282_v53, %v3282_v53 }
 0x3a1   : > { %v968_v10 = vpop.xlane.xlu1 %967 }
 0x3a2   : > { %v1005_v56 = vsub.f32 %v936_v0, %v989_v6  ;;  %v990_v18 = vmul.f32 0.03125, %v968_v10  ;;  %v1035_v19 = vmul.f32 %v3287_v9, %v3287_v9  ;;  %v3296_v54 = vmul.f32 %v3240_v26, %v1004_v5  ;;  %2085 = vmatpush3.bf16.msra.mxu1 %v2321_v14 }
 0x3a3   : > { %v970_v59 = vpop.xlane.xlu0 %969  ;;  %2086 = vmatprep.subr.bf16.mxu1 %v2322_v49 }
 0x3a4   : > { %v1006_v20 = vsub.f32 %v937_v3, %v990_v18  ;;  %v991_v21 = vmul.f32 0.03125, %v970_v59  ;;  %1055 = vadd.xlane.f32.xlu1 %v1034_v51  ;;  %1057 = vadd.xlane.f32.xlu0 %v1035_v19  ;;  %v3301_v22 = vmul.f32 %v3240_v26, %v1005_v56  ;;  %v1036_v60 = vmul.f32 %v3296_v54, %v3296_v54 }
 0x3a5   : > { %v972_v23 = vpop.xlane.xlu1 %971 }
 0x3a6   : > { %v1007_v0 = vsub.f32 %v938_v4, %v991_v21  ;;  %v992_v24 = vmul.f32 0.03125, %v972_v23  ;;  %v1037_v25 = vmul.f32 %v3301_v22, %v3301_v22  ;;  %v3310_v1 = vmul.f32 %v3240_v26, %v1006_v20  ;;  %2087 = vmatpush3.bf16.msra.mxu1 %v2322_v49 }
 0x3a7   : > { %v974_v3 = vpop.xlane.xlu0 %973  ;;  %2088 = vmatprep.subr.bf16.mxu1 %v2323_v50 }
 0x3a8   : > { %v1008_v28 = vsub.f32 %v939_v7, %v992_v24  ;;  %v993_v29 = vmul.f32 0.03125, %v974_v3  ;;  %1059 = vadd.xlane.f32.xlu1 %v1036_v60  ;;  %1061 = vadd.xlane.f32.xlu0 %v1037_v25  ;;  %v3315_v30 = vmul.f32 %v3240_v26, %v1007_v0  ;;  %v1038_v4 = vmul.f32 %v3310_v1, %v3310_v1 }
 0x3a9   : > { %v976_v63 = vpop.xlane.xlu1 %975 }
 0x3aa   : > { %v1009_v31 = vsub.f32 %v940_v12, %v993_v29  ;;  %v994_v32 = vmul.f32 0.03125, %v976_v63  ;;  %v1039_v34 = vmul.f32 %v3315_v30, %v3315_v30  ;;  %v3324_v2 = vmul.f32 %v3240_v26, %v1008_v28  ;;  %2089 = vmatpush3.bf16.msra.mxu1 %v2323_v50 }
 0x3ab   : > { %v978_v7 = vpop.xlane.xlu0 %977  ;;  %2090 = vmatprep.subr.bf16.mxu1 %v2324_v58 }
 0x3ac   : > { %v1010_v36 = vsub.f32 %v941_v15, %v994_v32  ;;  %v995_v35 = vmul.f32 0.03125, %v978_v7  ;;  %1063 = vadd.xlane.f32.xlu1 %v1038_v4  ;;  %1065 = vadd.xlane.f32.xlu0 %v1039_v34  ;;  %v3329_v37 = vmul.f32 %v3240_v26, %v1009_v31  ;;  %v1040_v39 = vmul.f32 %v3324_v2, %v3324_v2  ;;  %v3358_v32 = vld [vmem:[%s3782_s11 + $0x1] ss:$0 sm:$0xff] }
 0x3ad   : > { %v980_v12 = vpop.xlane.xlu1 %979 }
 0x3ae   : > { %v1011_v42 = vsub.f32 %v942_v16, %v995_v35  ;;  %v996_v40 = vmul.f32 0.03125, %v980_v12  ;;  %v1041_v43 = vmul.f32 %v3329_v37, %v3329_v37  ;;  %v3338_v13 = vmul.f32 %v3240_v26, %v1010_v36  ;;  %2091 = vmatpush3.bf16.msra.mxu1 %v2324_v58 }
 0x3b0   : > { %v1012_v15 = vsub.f32 %v943_v17, %v996_v40  ;;  %1067 = vadd.xlane.f32.xlu1 %v1040_v39  ;;  %1069 = vadd.xlane.f32.xlu0 %v1041_v43  ;;  %v3343_v44 = vmul.f32 %v3240_v26, %v1011_v42  ;;  %v1042_v11 = vmul.f32 %v3338_v13, %v3338_v13  ;;  %v3365_v43 = vld [vmem:[%s3782_s11 + $0x2] ss:$0 sm:$0xff] }
 0x3b2   : > { %v1043_v16 = vmul.f32 %v3343_v44, %v3343_v44  ;;  %v3350_v47 = vmul.f32 %v3240_v26, %v1012_v15 }
 0x3b4   : > { %1071 = vadd.xlane.f32.xlu1 %v1042_v11  ;;  %1073 = vadd.xlane.f32.xlu0 %v1043_v16  ;;  %v1044_v17 = vmul.f32 %v3350_v47, %v3350_v47 }
 0x3b8   : > { %1075 = vadd.xlane.f32.xlu1 %v1044_v17 }
 0x425   : > { %v1046_v48 = vpop.xlane.xlu0 %1045 }
 0x426   : > { %v1077_v52 = vmul.f32 0.03125, %v1046_v48 }
 0x428   : > { %v1093_v61 = vadd.f32 1e-05, %v1077_v52 }
 0x429   : > { %v1048_v62 = vpop.xlane.xlu1 %1047  ;;  %v1050_v55 = vpop.xlane.xlu0 %1049 }
 0x42a   : > { %2325 = vrsqrt.f32 %v1093_v61  ;;  %v1078_v5 = vmul.f32 0.03125, %v1048_v62  ;;  %v1079_v6 = vmul.f32 0.03125, %v1050_v55 }
 0x42c   : > { %v1094_v10 = vadd.f32 1e-05, %v1078_v5  ;;  %v1095_v51 = vadd.f32 1e-05, %v1079_v6 }
 0x42d   : > { %v1052_v56 = vpop.xlane.xlu1 %1051  ;;  %v1054_v18 = vpop.xlane.xlu0 %1053 }
 0x42e   : > { %2327 = vrsqrt.f32 %v1094_v10  ;;  %v1080_v19 = vmul.f32 0.03125, %v1052_v56  ;;  %v1081_v59 = vmul.f32 0.03125, %v1054_v18 }
 0x42f   : > { %2329 = vrsqrt.f32 %v1095_v51 }
 0x430   : > { %v1096_v20 = vadd.f32 1e-05, %v1080_v19  ;;  %v1097_v21 = vadd.f32 1e-05, %v1081_v59 }
 0x431   : > { %v1056_v23 = vpop.xlane.xlu1 %1055  ;;  %v1058_v60 = vpop.xlane.xlu0 %1057 }
 0x432   : > { %2331 = vrsqrt.f32 %v1096_v20  ;;  %v1082_v0 = vmul.f32 0.03125, %v1056_v23  ;;  %v1083_v24 = vmul.f32 0.03125, %v1058_v60 }
 0x433   : > { %2333 = vrsqrt.f32 %v1097_v21 }
 0x434   : > { %v2326_v25 = vpop.eup %2325  ;;  %v1098_v3 = vadd.f32 1e-05, %v1082_v0  ;;  %v1099_v27 = vadd.f32 1e-05, %v1083_v24 }
 0x435   : > { %v1060_v28 = vpop.xlane.xlu1 %1059  ;;  %v1062_v29 = vpop.xlane.xlu0 %1061  ;;  %v1125_v63 = vmul.f32 %v2326_v25, %v3247_v33 }
 0x436   : > { %2335 = vrsqrt.f32 %v1098_v3  ;;  %v1084_v4 = vmul.f32 0.03125, %v1060_v28  ;;  %v1085_v31 = vmul.f32 0.03125, %v1062_v29 }
 0x437   : > { %2337 = vrsqrt.f32 %v1099_v27  ;;  %v1145_v42 = vmul.f32 %v3358_v32, %v1125_v63 }
 0x438   : > { %v2328_v34 = vpop.eup %2327  ;;  %v1100_v7 = vadd.f32 1e-05, %v1084_v4  ;;  %v1101_v36 = vadd.f32 1e-05, %v1085_v31 }
 0x439   : > { %v2330_v35 = vpop.eup %2329  ;;  %v1064_v8 = vpop.xlane.xlu1 %1063  ;;  %v1126_v39 = vmul.f32 %v2328_v34, %v3259_v41  ;;  %v1165_v50 = vadd.f32 %v3365_v43, %v1145_v42 }
 0x43a   : > { %v1066_v12 = vpop.xlane.xlu0 %1065  ;;  %2339 = vrsqrt.f32 %v1100_v7  ;;  %v1086_v33 = vmul.f32 0.03125, %v1064_v8  ;;  %v1127_v15 = vmul.f32 %v2330_v35, %v3256_v38 }
 0x43b   : > { %v1087_v40 = vmul.f32 0.03125, %v1066_v12  ;;  %2341 = vrsqrt.f32 %v1101_v36  ;;  %v1146_v45 = vmul.f32 %v3358_v32, %v1126_v39 }
 0x43c   : > { %v2332_v11 = vpop.eup %2331  ;;  %v1102_v16 = vadd.f32 1e-05, %v1086_v33  ;;  %v1147_v52 = vmul.f32 %v3358_v32, %v1127_v15 }
 0x43d   : > { %v1103_v14 = vadd.f32 1e-05, %v1087_v40  ;;  %v2334_v17 = vpop.eup %2333  ;;  %v1068_v41 = vpop.xlane.xlu1 %1067  ;;  %v1166_v58 = vadd.f32 %v3365_v43, %v1146_v45  ;;  %v1128_v48 = vmul.f32 %v2332_v11, %v3262_v46 }
 0x43e   : > { %v1070_v49 = vpop.xlane.xlu0 %1069  ;;  %2343 = vrsqrt.f32 %v1102_v16  ;;  %v1088_v61 = vmul.f32 0.03125, %v1068_v41  ;;  %v1129_v5 = vmul.f32 %v2334_v17, %v3273_v57  ;;  %v1167_v46 = vadd.f32 %v3365_v43, %v1147_v52 }
 0x43f   : > { %v1089_v38 = vmul.f32 0.03125, %v1070_v49  ;;  %2345 = vrsqrt.f32 %v1103_v14  ;;  %v1181_v62 = vpack.c.bf16 %v1166_v58, %v1165_v50  ;;  %v1148_v55 = vmul.f32 %v3358_v32, %v1128_v48 }
 0x440   : > { %v2336_v6 = vpop.eup %2335  ;;  %v1104_v10 = vadd.f32 1e-05, %v1088_v61  ;;  %v1149_v21 = vmul.f32 %v3358_v32, %v1129_v5 }
 0x441   : > { %v1105_v51 = vadd.f32 1e-05, %v1089_v38  ;;  %v2338_v56 = vpop.eup %2337  ;;  %v1072_v18 = vpop.xlane.xlu1 %1071  ;;  %2092 = vmatprep.mubr.bf16.mxu1 %v1181_v62  ;;  %v1168_v59 = vadd.f32 %v3365_v43, %v1148_v55  ;;  %v1130_v20 = vmul.f32 %v2336_v6, %v3282_v53 }
 0x442   : > { %v1074_v19 = vpop.xlane.xlu0 %1073  ;;  %2347 = vrsqrt.f32 %v1104_v10  ;;  %v1090_v23 = vmul.f32 0.03125, %v1072_v18  ;;  %v1131_v57 = vmul.f32 %v2338_v56, %v3287_v9  ;;  %v1169_v63 = vadd.f32 %v3365_v43, %v1149_v21 }
 0x443   : > { %v1091_v60 = vmul.f32 0.03125, %v1074_v19  ;;  %2349 = vrsqrt.f32 %v1105_v51  ;;  %v1182_v0 = vpack.c.bf16 %v1168_v59, %v1167_v46  ;;  %v1150_v24 = vmul.f32 %v3358_v32, %v1130_v20  ;;  %v1866_v46 = vld [vmem:[%s3783_s5] ss:$0 sm:$0xff] }
 0x444   : > { %v2340_v25 = vpop.eup %2339  ;;  %v1106_v3 = vadd.f32 1e-05, %v1090_v23  ;;  %v1151_v31 = vmul.f32 %v3358_v32, %v1131_v57 }
 0x445   : > { %v1107_v27 = vadd.f32 1e-05, %v1091_v60  ;;  %v2342_v28 = vpop.eup %2341  ;;  %v1076_v29 = vpop.xlane.xlu1 %1075  ;;  %2093 = vmatmul.mubr.bf16.vlgmr.msra.gmra.mrb[0].mxu1 %v1182_v0  ;;  %v1170_v53 = vadd.f32 %v3365_v43, %v1150_v24  ;;  %v1132_v4 = vmul.f32 %v2340_v25, %v3296_v54 }
 0x446   : > { %2351 = vrsqrt.f32 %v1106_v3  ;;  %v1092_v9 = vmul.f32 0.03125, %v1076_v29  ;;  %v1133_v34 = vmul.f32 %v2342_v28, %v3301_v22  ;;  %v1171_v39 = vadd.f32 %v3365_v43, %v1151_v31 }
 0x447   : > { %2353 = vrsqrt.f32 %v1107_v27  ;;  %v1183_v7 = vpack.c.bf16 %v1170_v53, %v1169_v63  ;;  %v1152_v36 = vmul.f32 %v3358_v32, %v1132_v4 }
 0x448   : > { %v2344_v35 = vpop.eup %2343  ;;  %v1108_v8 = vadd.f32 1e-05, %v1092_v9  ;;  %v1153_v33 = vmul.f32 %v3358_v32, %v1133_v34 }
 0x449   : > { %v2346_v12 = vpop.eup %2345  ;;  %2096 = vmatprep.mubr.bf16.mxu1 %v1183_v7  ;;  %v1172_v42 = vadd.f32 %v3365_v43, %v1152_v36  ;;  %v1134_v54 = vmul.f32 %v2344_v35, %v3310_v1 }
 0x44a   : > { %2355 = vrsqrt.f32 %v1108_v8  ;;  %v1135_v40 = vmul.f32 %v2346_v12, %v3315_v30  ;;  %v1173_v16 = vadd.f32 %v3365_v43, %v1153_v33 }
 0x44b   : > { %v1184_v22 = vpack.c.bf16 %v1172_v42, %v1171_v39  ;;  %v1154_v15 = vmul.f32 %v3358_v32, %v1134_v54 }
 0x44c   : > { %v2348_v45 = vpop.eup %2347  ;;  %v1155_v41 = vmul.f32 %v3358_v32, %v1135_v40 }
 0x44d   : > { %v2350_v11 = vpop.eup %2349  ;;  %2097 = vmatmul.mubr.bf16.gmra.mrb[4].mxu1 %v1184_v22  ;;  %v1174_v14 = vadd.f32 %v3365_v43, %v1154_v15  ;;  %v1136_v17 = vmul.f32 %v2348_v45, %v3324_v2 }
 0x44e   : > { %v1137_v1 = vmul.f32 %v2350_v11, %v3329_v37  ;;  %v1175_v48 = vadd.f32 %v3365_v43, %v1155_v41 }
 0x44f   : > { %v1185_v49 = vpack.c.bf16 %v1174_v14, %v1173_v16  ;;  %v1156_v50 = vmul.f32 %v3358_v32, %v1136_v17 }
 0x450   : > { %v2352_v30 = vpop.eup %2351  ;;  %v1157_v38 = vmul.f32 %v3358_v32, %v1137_v1 }
 0x451   : > { %v2354_v58 = vpop.eup %2353  ;;  %2100 = vmatprep.mubr.bf16.mxu1 %v1185_v49  ;;  %v1176_v52 = vadd.f32 %v3365_v43, %v1156_v50  ;;  %v1138_v61 = vmul.f32 %v2352_v30, %v3338_v13 }
 0x452   : > { %v1139_v2 = vmul.f32 %v2354_v58, %v3343_v44  ;;  %v1177_v5 = vadd.f32 %v3365_v43, %v1157_v38 }
 0x453   : > { %v1186_v62 = vpack.c.bf16 %v1176_v52, %v1175_v48  ;;  %v1158_v55 = vmul.f32 %v3358_v32, %v1138_v61 }
 0x454   : > { %v2356_v37 = vpop.eup %2355  ;;  %v1159_v51 = vmul.f32 %v3358_v32, %v1139_v2 }
 0x455   : > { %2101 = vmatmul.mubr.bf16.gmra.mrb[8].mxu1 %v1186_v62  ;;  %v1178_v6 = vadd.f32 %v3365_v43, %v1158_v55  ;;  %v1140_v10 = vmul.f32 %v2356_v37, %v3350_v47 }
 0x456   : > { %v1179_v18 = vadd.f32 %v3365_v43, %v1159_v51 }
 0x457   : > { %v1187_v56 = vpack.c.bf16 %v1178_v6, %v1177_v5  ;;  %v1160_v13 = vmul.f32 %v3358_v32, %v1140_v10 }
 0x459   : > { %2104 = vmatprep.mubr.bf16.mxu1 %v1187_v56  ;;  %v1180_v44 = vadd.f32 %v3365_v43, %v1160_v13 }
 0x45b   : > { %v1188_v19 = vpack.c.bf16 %v1180_v44, %v1179_v18 }
 0x45d   : > { %2105 = vmatmul.mubr.bf16.gmra.mrb[12].mxu1 %v1188_v19 }
 0x518   : > { %v2094_v59 = vpop.f32.mrb[0].mxu1 }
 0x519   : > { %v1300_v20 = vadd.f32 %v2094_v59, %v1866_v46  ;;  %v1291_v21 = vpop.f32.mrb[1].mxu1 }
 0x51a   : > { %v2095_v47 = vpop.f32.mrb[2].mxu1  ;;  %v1292_v57 = vadd.f32 %v1866_v46, %v1291_v21 }
 0x51b   : > { %v1303_v23 = vadd.f32 %v2095_v47, %v1866_v46  ;;  %1360 = vadd.xlane.f32.xlu0 %v1300_v20  ;;  %v1294_v60 = vpop.f32.mrb[3].mxu1 }
 0x51c   : > { %v3415_v32 = vadd.f32 %v1866_v46, %v1294_v60 }
 0x51d   : > { %1362 = vadd.xlane.f32.xlu1 %v1303_v23 }
 0x51f   : > { %1356 = vadd.xlane.f32.xlu0 %v1292_v57 }
 0x520   : > { %v2098_v0 = vpop.f32.mrb[4].mxu1 }
 0x521   : > { %v3417_v43 = vadd.f32 %v2098_v0, %v1866_v46  ;;  %v1307_v24 = vpop.f32.mrb[5].mxu1  ;;  %1358 = vadd.xlane.f32.xlu1 %v3415_v32 }
 0x522   : > { %v2099_v25 = vpop.f32.mrb[6].mxu1  ;;  %v3423_v28 = vadd.f32 %v1866_v46, %v1307_v24 }
 0x523   : > { %v3420_v3 = vadd.f32 %v2099_v25, %v1866_v46  ;;  %v1310_v27 = vpop.f32.mrb[7].mxu1  ;;  %1368 = vadd.xlane.f32.xlu0 %v3417_v43 }
 0x524   : > { %v3426_v29 = vadd.f32 %v1866_v46, %v1310_v27 }
 0x525   : > { %1370 = vadd.xlane.f32.xlu1 %v3420_v3 }
 0x527   : > { %1364 = vadd.xlane.f32.xlu0 %v3423_v28 }
 0x528   : > { %v2102_v63 = vpop.f32.mrb[8].mxu1 }
 0x529   : > { %v3429_v53 = vadd.f32 %v2102_v63, %v1866_v46  ;;  %v1323_v4 = vpop.f32.mrb[9].mxu1  ;;  %1366 = vadd.xlane.f32.xlu1 %v3426_v29 }
 0x52a   : > { %v2103_v31 = vpop.f32.mrb[10].mxu1  ;;  %v3435_v7 = vadd.f32 %v1866_v46, %v1323_v4 }
 0x52b   : > { %v3432_v9 = vadd.f32 %v2103_v31, %v1866_v46  ;;  %v1326_v34 = vpop.f32.mrb[11].mxu1  ;;  %1376 = vadd.xlane.f32.xlu0 %v3429_v53 }
 0x52c   : > { %v3438_v36 = vadd.f32 %v1866_v46, %v1326_v34 }
 0x52d   : > { %1378 = vadd.xlane.f32.xlu1 %v3432_v9 }
 0x52f   : > { %1372 = vadd.xlane.f32.xlu0 %v3435_v7 }
 0x530   : > { %v2106_v35 = vpop.f32.mrb[12].mxu1 }
 0x531   : > { %v1339_v8 = vpop.f32.mrb[13].mxu1  ;;  %1374 = vadd.xlane.f32.xlu1 %v3438_v36  ;;  %v3447_v33 = vadd.f32 %v2106_v35, %v1866_v46 }
 0x532   : > { %v3442_v12 = vadd.f32 %v1866_v46, %v1339_v8  ;;  %v2107_v39 = vpop.f32.mrb[14].mxu1 }
 0x533   : > { %v1342_v42 = vpop.f32.mrb[15].mxu1  ;;  %v3450_v40 = vadd.f32 %v2107_v39, %v1866_v46 }
 0x534   : > { %v3444_v54 = vadd.f32 %v1866_v46, %v1342_v42  ;;  %1380 = vadd.xlane.f32.xlu0 %v3442_v12 }
 0x536   : > { %1382 = vadd.xlane.f32.xlu1 %v3444_v54 }
 0x538   : > { %1384 = vadd.xlane.f32.xlu0 %v3447_v33 }
 0x53a   : > { %1386 = vadd.xlane.f32.xlu1 %v3450_v40 }
 0x5a8   : > { %v1361_v22 = vpop.xlane.xlu0 %1360 }
 0x5a9   : > { %v1390_v15 = vmul.f32 0.03125, %v1361_v22 }
 0x5aa   : > { %v1363_v45 = vpop.xlane.xlu1 %1362 }
 0x5ab   : > { %v1406_v11 = vsub.f32 %v1300_v20, %v1390_v15  ;;  %v1391_v16 = vmul.f32 0.03125, %v1363_v45 }
 0x5ac   : > { %v1357_v14 = vpop.xlane.xlu0 %1356 }
 0x5ad   : > { %v1407_v17 = vsub.f32 %v1303_v23, %v1391_v16  ;;  %v1388_v41 = vmul.f32 0.03125, %v1357_v14  ;;  %v3455_v1 = vmul.f32 %v3240_v26, %v1406_v11 }
 0x5ae   : > { %v1359_v49 = vpop.xlane.xlu1 %1358 }
 0x5af   : > { %v1404_v50 = vsub.f32 %v1292_v57, %v1388_v41  ;;  %v1389_v30 = vmul.f32 0.03125, %v1359_v49  ;;  %v1438_v58 = vmul.f32 %v3455_v1, %v3455_v1  ;;  %v3460_v48 = vmul.f32 %v3240_v26, %v1407_v17 }
 0x5b0   : > { %v1369_v52 = vpop.xlane.xlu0 %1368 }
 0x5b1   : > { %v1405_v61 = vsub.f32 %v3415_v32, %v1389_v30  ;;  %v1394_v38 = vmul.f32 0.03125, %v1369_v52  ;;  %1456 = vadd.xlane.f32.xlu0 %v1438_v58  ;;  %v1439_v2 = vmul.f32 %v3460_v48, %v3460_v48  ;;  %v3466_v62 = vmul.f32 %v3240_v26, %v1404_v50 }
 0x5b2   : > { %v1371_v55 = vpop.xlane.xlu1 %1370 }
 0x5b3   : > { %v1410_v37 = vsub.f32 %v3417_v43, %v1394_v38  ;;  %v1395_v5 = vmul.f32 0.03125, %v1371_v55  ;;  %1458 = vadd.xlane.f32.xlu1 %v1439_v2  ;;  %v1436_v6 = vmul.f32 %v3466_v62, %v3466_v62  ;;  %v3472_v10 = vmul.f32 %v3240_v26, %v1405_v61 }
 0x5b4   : > { %v1365_v51 = vpop.xlane.xlu0 %1364 }
 0x5b5   : > { %v1411_v56 = vsub.f32 %v3420_v3, %v1395_v5  ;;  %v1392_v13 = vmul.f32 0.03125, %v1365_v51  ;;  %1452 = vadd.xlane.f32.xlu0 %v1436_v6  ;;  %v1437_v18 = vmul.f32 %v3472_v10, %v3472_v10  ;;  %v3478_v44 = vmul.f32 %v3240_v26, %v1410_v37 }
 0x5b6   : > { %v1367_v19 = vpop.xlane.xlu1 %1366 }
 0x5b7   : > { %v1408_v46 = vsub.f32 %v3423_v28, %v1392_v13  ;;  %v1393_v59 = vmul.f32 0.03125, %v1367_v19  ;;  %1454 = vadd.xlane.f32.xlu1 %v1437_v18  ;;  %v1442_v20 = vmul.f32 %v3478_v44, %v3478_v44  ;;  %v3484_v21 = vmul.f32 %v3240_v26, %v1411_v56 }
 0x5b8   : > { %v1377_v47 = vpop.xlane.xlu0 %1376 }
 0x5b9   : > { %v1409_v23 = vsub.f32 %v3426_v29, %v1393_v59  ;;  %v1398_v60 = vmul.f32 0.03125, %v1377_v47  ;;  %1464 = vadd.xlane.f32.xlu0 %v1442_v20  ;;  %v1443_v57 = vmul.f32 %v3484_v21, %v3484_v21  ;;  %v3490_v32 = vmul.f32 %v3240_v26, %v1408_v46 }
 0x5ba   : > { %v1379_v0 = vpop.xlane.xlu1 %1378 }
 0x5bb   : > { %v1414_v43 = vsub.f32 %v3429_v53, %v1398_v60  ;;  %v1399_v24 = vmul.f32 0.03125, %v1379_v0  ;;  %1466 = vadd.xlane.f32.xlu1 %v1443_v57  ;;  %v1440_v25 = vmul.f32 %v3490_v32, %v3490_v32  ;;  %v3496_v3 = vmul.f32 %v3240_v26, %v1409_v23 }
 0x5bc   : > { %v1373_v27 = vpop.xlane.xlu0 %1372 }
 0x5bd   : > { %v1415_v28 = vsub.f32 %v3432_v9, %v1399_v24  ;;  %v1396_v29 = vmul.f32 0.03125, %v1373_v27  ;;  %1460 = vadd.xlane.f32.xlu0 %v1440_v25  ;;  %v1441_v63 = vmul.f32 %v3496_v3, %v3496_v3  ;;  %v3502_v4 = vmul.f32 %v3240_v26, %v1414_v43 }
 0x5be   : > { %v1375_v53 = vpop.xlane.xlu1 %1374 }
 0x5bf   : > { %v1412_v31 = vsub.f32 %v3435_v7, %v1396_v29  ;;  %v1397_v34 = vmul.f32 0.03125, %v1375_v53  ;;  %1462 = vadd.xlane.f32.xlu1 %v1441_v63  ;;  %v1446_v35 = vmul.f32 %v3502_v4, %v3502_v4  ;;  %v3508_v8 = vmul.f32 %v3240_v26, %v1415_v28  ;;  %v3550_v29 = vld [vmem:[%s3783_s5 + $0x1] ss:$0 sm:$0xff] }
 0x5c1   : > { %v1413_v9 = vsub.f32 %v3438_v36, %v1397_v34  ;;  %1472 = vadd.xlane.f32.xlu0 %v1446_v35  ;;  %v1381_v39 = vpop.xlane.xlu0 %1380  ;;  %v1447_v42 = vmul.f32 %v3508_v8, %v3508_v8  ;;  %v3514_v22 = vmul.f32 %v3240_v26, %v1412_v31 }
 0x5c2   : > { %v1400_v15 = vmul.f32 0.03125, %v1381_v39 }
 0x5c3   : > { %1474 = vadd.xlane.f32.xlu1 %v1447_v42  ;;  %v1383_v7 = vpop.xlane.xlu1 %1382  ;;  %v1444_v45 = vmul.f32 %v3514_v22, %v3514_v22  ;;  %v3519_v11 = vmul.f32 %v3240_v26, %v1413_v9 }
 0x5c4   : > { %v1416_v16 = vsub.f32 %v3442_v12, %v1400_v15  ;;  %v1401_v36 = vmul.f32 0.03125, %v1383_v7 }
 0x5c5   : > { %1468 = vadd.xlane.f32.xlu0 %v1444_v45  ;;  %v1385_v14 = vpop.xlane.xlu0 %1384  ;;  %v1445_v17 = vmul.f32 %v3519_v11, %v3519_v11 }
 0x5c6   : > { %v1417_v41 = vsub.f32 %v3444_v54, %v1401_v36  ;;  %v1402_v49 = vmul.f32 0.03125, %v1385_v14  ;;  %v3526_v50 = vmul.f32 %v3240_v26, %v1416_v16  ;;  %v3558_v16 = vld [vmem:[%s3783_s5 + $0x2] ss:$0 sm:$0xff] }
 0x5c7   : > { %1470 = vadd.xlane.f32.xlu1 %v1445_v17  ;;  %v1387_v30 = vpop.xlane.xlu1 %1386 }
 0x5c8   : > { %v1418_v58 = vsub.f32 %v3447_v33, %v1402_v49  ;;  %v1403_v52 = vmul.f32 0.03125, %v1387_v30  ;;  %v1448_v12 = vmul.f32 %v3526_v50, %v3526_v50  ;;  %v3532_v61 = vmul.f32 %v3240_v26, %v1417_v41 }
 0x5ca   : > { %v1419_v38 = vsub.f32 %v3450_v40, %v1403_v52  ;;  %1476 = vadd.xlane.f32.xlu0 %v1448_v12  ;;  %v1449_v54 = vmul.f32 %v3532_v61, %v3532_v61  ;;  %v3538_v2 = vmul.f32 %v3240_v26, %v1418_v58 }
 0x5cc   : > { %1478 = vadd.xlane.f32.xlu1 %v1449_v54  ;;  %v1450_v33 = vmul.f32 %v3538_v2, %v3538_v2  ;;  %v3543_v55 = vmul.f32 %v3240_v26, %v1419_v38 }
 0x5ce   : > { %1480 = vadd.xlane.f32.xlu0 %v1450_v33  ;;  %v1451_v37 = vmul.f32 %v3543_v55, %v3543_v55 }
 0x5d0   : > { %1482 = vadd.xlane.f32.xlu1 %v1451_v37 }
 0x63e   : > { %v1457_v40 = vpop.xlane.xlu0 %1456 }
 0x63f   : > { %v1486_v5 = vmul.f32 0.03125, %v1457_v40 }
 0x640   : > { %v1459_v6 = vpop.xlane.xlu1 %1458 }
 0x641   : > { %v1502_v51 = vadd.f32 1e-05, %v1486_v5  ;;  %v1487_v56 = vmul.f32 0.03125, %v1459_v6 }
 0x642   : > { %v1453_v13 = vpop.xlane.xlu0 %1452 }
 0x643   : > { %2357 = vrsqrt.f32 %v1502_v51  ;;  %v1503_v18 = vadd.f32 1e-05, %v1487_v56  ;;  %v1484_v19 = vmul.f32 0.03125, %v1453_v13 }
 0x644   : > { %v1455_v46 = vpop.xlane.xlu1 %1454 }
 0x645   : > { %2359 = vrsqrt.f32 %v1503_v18  ;;  %v1500_v59 = vadd.f32 1e-05, %v1484_v19  ;;  %v1485_v20 = vmul.f32 0.03125, %v1455_v46 }
 0x646   : > { %v1465_v26 = vpop.xlane.xlu0 %1464 }
 0x647   : > { %2361 = vrsqrt.f32 %v1500_v59  ;;  %v1501_v47 = vadd.f32 1e-05, %v1485_v20  ;;  %v1490_v23 = vmul.f32 0.03125, %v1465_v26 }
 0x648   : > { %v1467_v60 = vpop.xlane.xlu1 %1466 }
 0x649   : > { %2363 = vrsqrt.f32 %v1501_v47  ;;  %v1506_v57 = vadd.f32 1e-05, %v1490_v23  ;;  %v1491_v0 = vmul.f32 0.03125, %v1467_v60 }
 0x64a   : > { %v1461_v43 = vpop.xlane.xlu0 %1460 }
 0x64b   : > { %2365 = vrsqrt.f32 %v1506_v57  ;;  %v1507_v24 = vadd.f32 1e-05, %v1491_v0  ;;  %v1488_v25 = vmul.f32 0.03125, %v1461_v43 }
 0x64c   : > { %v1463_v27 = vpop.xlane.xlu1 %1462 }
 0x64d   : > { %v2358_v28 = vpop.eup %2357  ;;  %2367 = vrsqrt.f32 %v1507_v24  ;;  %v1504_v63 = vadd.f32 1e-05, %v1488_v25  ;;  %v1489_v53 = vmul.f32 0.03125, %v1463_v27 }
 0x64e   : > { %v1534_v31 = vmul.f32 %v2358_v28, %v3455_v1  ;;  %v1473_v34 = vpop.xlane.xlu0 %1472 }
 0x64f   : > { %v2360_v35 = vpop.eup %2359  ;;  %2369 = vrsqrt.f32 %v1504_v63  ;;  %v1505_v9 = vadd.f32 1e-05, %v1489_v53  ;;  %v1494_v39 = vmul.f32 0.03125, %v1473_v34 }
 0x650   : > { %v1554_v42 = vmul.f32 %v3550_v29, %v1534_v31  ;;  %v1535_v15 = vmul.f32 %v2360_v35, %v3460_v48  ;;  %v1475_v7 = vpop.xlane.xlu1 %1474 }
 0x651   : > { %v2362_v45 = vpop.eup %2361  ;;  %2371 = vrsqrt.f32 %v1505_v9  ;;  %v1510_v36 = vadd.f32 1e-05, %v1494_v39  ;;  %v1495_v14 = vmul.f32 0.03125, %v1475_v7 }
 0x652   : > { %v1555_v1 = vmul.f32 %v3550_v29, %v1535_v15  ;;  %v1532_v17 = vmul.f32 %v2362_v45, %v3466_v62  ;;  %v1469_v41 = vpop.xlane.xlu0 %1468  ;;  %v1574_v48 = vadd.f32 %v3558_v16, %v1554_v42 }
 0x653   : > { %v2364_v49 = vpop.eup %2363  ;;  %2373 = vrsqrt.f32 %v1510_v36  ;;  %v1511_v30 = vadd.f32 1e-05, %v1495_v14  ;;  %v1492_v58 = vmul.f32 0.03125, %v1469_v41 }
 0x654   : > { %v1575_v52 = vadd.f32 %v3558_v16, %v1555_v1  ;;  %v1552_v12 = vmul.f32 %v3550_v29, %v1532_v17  ;;  %v1533_v38 = vmul.f32 %v2364_v49, %v3472_v10  ;;  %v1471_v54 = vpop.xlane.xlu1 %1470 }
 0x655   : > { %v2366_v33 = vpop.eup %2365  ;;  %2375 = vrsqrt.f32 %v1511_v30  ;;  %v1508_v37 = vadd.f32 1e-05, %v1492_v58  ;;  %v1493_v40 = vmul.f32 0.03125, %v1471_v54 }
 0x656   : > { %v1925_v62 = vpack.c.bf16 %v1575_v52, %v1574_v48  ;;  %v1553_v5 = vmul.f32 %v3550_v29, %v1533_v38  ;;  %v1538_v6 = vmul.f32 %v2366_v33, %v3478_v44  ;;  %v1572_v56 = vadd.f32 %v3558_v16, %v1552_v12 }
 0x657   : > { %v2368_v51 = vpop.eup %2367  ;;  %2377 = vrsqrt.f32 %v1508_v37  ;;  %v1509_v13 = vadd.f32 1e-05, %v1493_v40  ;;  %v1477_v18 = vpop.xlane.xlu0 %1476 }
 0x658   : > { %1957 = vst [vmem:[%s3135_s8 + $0x8] sm:$0xff] %v1925_v62   ;;  %v1573_v10 = vadd.f32 %v3558_v16, %v1553_v5  ;;  %v1558_v19 = vmul.f32 %v3550_v29, %v1538_v6  ;;  %v1539_v46 = vmul.f32 %v2368_v51, %v3484_v21  ;;  %v1496_v59 = vmul.f32 0.03125, %v1477_v18 }
 0x659   : > { %v2370_v20 = vpop.eup %2369  ;;  %2379 = vrsqrt.f32 %v1509_v13  ;;  %v1479_v26 = vpop.xlane.xlu1 %1478 }
 0x65a   : > { %v1920_v47 = vpack.c.bf16 %v1573_v10, %v1572_v56  ;;  %v1559_v44 = vmul.f32 %v3550_v29, %v1539_v46  ;;  %v1536_v23 = vmul.f32 %v2370_v20, %v3490_v32  ;;  %v1578_v57 = vadd.f32 %v3558_v16, %v1558_v19 }
 0x65b   : > { %v2372_v60 = vpop.eup %2371  ;;  %v1512_v0 = vadd.f32 1e-05, %v1496_v59  ;;  %v1497_v43 = vmul.f32 0.03125, %v1479_v26  ;;  %v1481_v24 = vpop.xlane.xlu0 %1480 }
 0x65c   : > { %1921 = vst [vmem:[%s3135_s8] sm:$0xff] %v1920_v47   ;;  %v1579_v25 = vadd.f32 %v3558_v16, %v1559_v44  ;;  %v1556_v21 = vmul.f32 %v3550_v29, %v1536_v23  ;;  %v1537_v27 = vmul.f32 %v2372_v60, %v3496_v3  ;;  %v1498_v28 = vmul.f32 0.03125, %v1481_v24 }
 0x65d   : > { %v2374_v63 = vpop.eup %2373  ;;  %2381 = vrsqrt.f32 %v1512_v0  ;;  %v1513_v53 = vadd.f32 1e-05, %v1497_v43  ;;  %v1483_v31 = vpop.xlane.xlu1 %1482 }
 0x65e   : > { %v1935_v32 = vpack.c.bf16 %v1579_v25, %v1578_v57  ;;  %v1557_v34 = vmul.f32 %v3550_v29, %v1537_v27  ;;  %v1542_v35 = vmul.f32 %v2374_v63, %v3502_v4  ;;  %v1514_v39 = vadd.f32 1e-05, %v1498_v28 }
 0x65f   : > { %v2376_v9 = vpop.eup %2375  ;;  %2383 = vrsqrt.f32 %v1513_v53  ;;  %v1499_v42 = vmul.f32 0.03125, %v1483_v31  ;;  %v1576_v15 = vadd.f32 %v3558_v16, %v1556_v21 }
 0x660   : > { %1959 = vst [vmem:[%s3135_s8 + $0x18] sm:$0xff] %v1935_v32   ;;  %v1577_v3 = vadd.f32 %v3558_v16, %v1557_v34  ;;  %v1562_v7 = vmul.f32 %v3550_v29, %v1542_v35  ;;  %v1543_v45 = vmul.f32 %v2376_v9, %v3508_v8  ;;  %2385 = vrsqrt.f32 %v1514_v39 }
 0x661   : > { %v2378_v36 = vpop.eup %2377  ;;  %v1515_v14 = vadd.f32 1e-05, %v1499_v42 }
 0x662   : > { %v1930_v1 = vpack.c.bf16 %v1577_v3, %v1576_v15  ;;  %v1563_v4 = vmul.f32 %v3550_v29, %v1543_v45  ;;  %v1540_v17 = vmul.f32 %v2378_v36, %v3514_v22  ;;  %v1582_v49 = vadd.f32 %v3558_v16, %v1562_v7 }
 0x663   : > { %v2380_v41 = vpop.eup %2379  ;;  %2387 = vrsqrt.f32 %v1515_v14 }
 0x664   : > { %1958 = vst [vmem:[%s3135_s8 + $0x10] sm:$0xff] %v1930_v1   ;;  %v1583_v30 = vadd.f32 %v3558_v16, %v1563_v4  ;;  %v1560_v58 = vmul.f32 %v3550_v29, %v1540_v17  ;;  %v1541_v8 = vmul.f32 %v2380_v41, %v3519_v11 }
 0x666   : > { %v1945_v48 = vpack.c.bf16 %v1583_v30, %v1582_v49  ;;  %v1561_v52 = vmul.f32 %v3550_v29, %v1541_v8  ;;  %v1580_v38 = vadd.f32 %v3558_v16, %v1560_v58 }
 0x667   : > { %v2382_v12 = vpop.eup %2381 }
 0x668   : > { %1961 = vst [vmem:[%s3135_s8 + $0x28] sm:$0xff] %v1945_v48   ;;  %v1581_v22 = vadd.f32 %v3558_v16, %v1561_v52  ;;  %v1544_v54 = vmul.f32 %v2382_v12, %v3526_v50 }
 0x669   : > { %v2384_v33 = vpop.eup %2383 }
 0x66a   : > { %v1940_v37 = vpack.c.bf16 %v1581_v22, %v1580_v38  ;;  %v1564_v40 = vmul.f32 %v3550_v29, %v1544_v54  ;;  %v1545_v62 = vmul.f32 %v2384_v33, %v3532_v61  ;;  %v2386_v11 = vpop.eup %2385 }
 0x66b   : > { %v1546_v6 = vmul.f32 %v2386_v11, %v3538_v2 }
 0x66c   : > { %1960 = vst [vmem:[%s3135_s8 + $0x20] sm:$0xff] %v1940_v37   ;;  %v1565_v5 = vmul.f32 %v3550_v29, %v1545_v62  ;;  %v1584_v56 = vadd.f32 %v3558_v16, %v1564_v40 }
 0x66d   : > { %v2388_v51 = vpop.eup %2387  ;;  %v1566_v50 = vmul.f32 %v3550_v29, %v1546_v6 }
 0x66e   : > { %v1585_v13 = vadd.f32 %v3558_v16, %v1565_v5  ;;  %v1547_v18 = vmul.f32 %v2388_v51, %v3543_v55 }
 0x66f   : > { %v1586_v61 = vadd.f32 %v3558_v16, %v1566_v50 }
 0x670   : > { %v1950_v10 = vpack.c.bf16 %v1585_v13, %v1584_v56  ;;  %v1567_v19 = vmul.f32 %v3550_v29, %v1547_v18 }
 0x672   : > { %1962 = vst [vmem:[%s3135_s8 + $0x30] sm:$0xff] %v1950_v10   ;;  %v1587_v46 = vadd.f32 %v3558_v16, %v1567_v19 }
 0x674   : > { %v1955_v59 = vpack.c.bf16 %v1587_v46, %v1586_v61 }
 0x676   : > { %1963 = vst [vmem:[%s3135_s8 + $0x38] sm:$0xff] %v1955_v59  }
 0x677 PF: > { %s3784_s18 = sld [smem:[#allocation28_spill]]  ;;  %s3785_s13 = sld [smem:[#allocation31_spill]] }
 0x678   : > { %s3786_s6 = sld [smem:[#allocation41_spill]]  ;;  %s1682_s20 = sshll.u32 %s3135_s8, 4  ;;  %s3620_s20 = int_to_ptr.vmem [resolvable:$true] %s1682_s20 }
 0x679   : > { %s3624_s4 = scalar_lea.sflag [#allocation8], %s410_s12  ;;  %s2527_s27 = scalar_lea.vmem %s3620_s20, 1024 }
 0x67a   : > { %p2528_p7 = scmp.ne.s32.totalorder %s3620_s20, %s2527_s27  ;;  %s2700_s30 = smov [#allocation14]  }
 0x67b   : > { %s2531_s21 = sshll.u32 %s2700_s30, 4  ;;  %s2532_s21 = int_to_ptr.vmem [resolvable:$false] %s2531_s21 }
 0x67c   : > { %s2533_s14 = scalar_lea.vmem %s2532_s21, 2048  ;;  %p2534_p4 = scmp.lt.s32.totalorder %s3620_s20, %s2532_s21 }
 0x67d   : > { %s1916_s10 = sshll.u32 %s3784_s18, 10  ;;  %p3787_p12 = scmp.ne.s32.totalorder %s3785_s13, 0 }
 0x67e   : > { %s3617_s15 = scalar_lea.hbm %s3786_s6, %s1916_s10  ;;  %p2535_p1 = scmp.lt.s32.totalorder %s2533_s14, %s2527_s27 }
 0x67f   : > { %p2529_p6 = pnand %p2528_p7, %p3787_p12 }
 0x680   : > { %p2536_p3 = por %p2535_p1, %p2534_p4 }
 0x681   : > { %p2530_p0 = pneg %p2529_p6 }
 0x683   : > { %p2537_p10 = pnand %p2536_p3, %p2530_p0 }
 0x685   : > { %2540 = shalt.err (!%p2537_p10)
}
 0x686   : > { %s2541_s12 = scalar_lea.hbm %s3617_s15, 1024  ;;  %s2545_s29 = scalar_lea.hbm %s3786_s6, 2048 }
 0x687   : > { %p2542_p11 = scmp.ne.s32.totalorder %s3617_s15, %s2541_s12  ;;  %p2546_p2 = scmp.lt.u32.totalorder %s3617_s15, %s3786_s6 }
 0x688   : > { %p2547_p8 = scmp.lt.u32.totalorder %s2545_s29, %s2541_s12  ;;  %p2549_p7 = scmp.lt.u32.totalorder %s2541_s12, %s3617_s15 }
 0x689   : > { %p2543_p13 = pnand %p2542_p11, %p3787_p12 }
 0x68a   : > { %p2548_p9 = por %p2547_p8, %p2546_p2 }
 0x68b   : > { %p2544_p5 = pneg %p2543_p13 }
 0x68c   : > { %p2550_p6 = por %p2549_p7, %p2548_p9 }
 0x68e   : > { %p2551_p0 = pnand %p2550_p6, %p2544_p5 }
 0x690   : > { %2554 = shalt.err (!%p2551_p0)
}
 0x691   : > { %s2701_s17 = smov 64   ;;  %s2702_s18 = smov 4  }
 0x692   : > { %2140 = dma.vmem_to_hbm [thread:$0]  (%p3787_p12), %s3620_s20, 1024, %s3617_s15, %s3624_s4, %s2701_s17, %s2701_s17, %s2702_s18  }
 0x693 PF: > { %s3788_s10 = sld [smem:[#allocation25_spill]]  ;;  %s3789_s24 = sld [smem:[#allocation32_spill]] }
 0x694   : > { %p2169_p4 = scmp.ge.s32.totalorder %s2687_s9, 2 }
 0x699   : > { %s1697_s0 = sand.u32 1, %s3788_s10   ;;  %p3790_p1 = scmp.ne.s32.totalorder %s3789_s24, 0 }
 0x69a   : > { %s1698_s27 = scalar_lea.sflag [#allocation8], %s1697_s0 }
 0x69b   : > { %p2161_p3 = pnand %p2169_p4, %p3790_p1 }
 0x69d   : > { %2630 = dma.done.wait (!%p2161_p3), %s1698_s27, 1024  }
 0x69e   : > { %2632 = vsyncadd (!%p2161_p3), %s1698_s27, 4294966272  ;;  %s36_s9 = sadd.s32 1, %s2687_s9   ;;  %s3792_s13 = sld [smem:[#allocation26_spill]] }
 0x69f   : > { %p3653_p10 = scmp.ge.s32.totalorder %s36_s9, 6   ;;  %s3793_s20 = sld [smem:[#allocation35_spill]] }
 0x6a0   : > { %s3794_s15 = sld [smem:[#allocation36_spill]]  ;;  %s3795_s27 = sld [smem:[#allocation29_spill]] }
 0x6a1   : > { %s3796_s28 = sld [smem:[#allocation30_spill]]  ;;  %s3797_s29 = sld [smem:[#allocation33_spill]] }
 0x6a2   : > { %s3798_s4 = sld [smem:[#allocation34_spill]]  ;;  %s3800_s0 = smov %s2639_s1 }
 0x6a3   : > { %s3802_s21 = smov %s2651_s22  ;;  %s3803_s22 = smov %s2655_s23 }
 0x6a4   : > { %s3801_s1 = smov %s3792_s13  ;;  %s3804_s23 = smov %s3048_s19 }
 0x6a5   : > { %s3805_s24 = smov %s2663_s25  ;;  %s3806_s25 = smov %s2667_s26 }
 0x6a6   : > { %s3807_s26 = smov %s3794_s15  ;;  %35 = sbr.rel (!%p3653_p10) target bundleno = 36 (0x24), region = 122 }
 0x6a8   : > { %s3808_s30 = smov %s3798_s4 }
 0x6ad   :  { %1703 = vsyncpa [#allocation7], 1 }
 0x6ae   :  { %1705 = vsyncpa [#allocation7 + $0x1], 1 }
 0x6af   :  { %1706 = vsyncpa [#allocation10], 1 }
 0x6b0   :  { %1708 = vsyncpa [#allocation10 + $0x1], 1 }
 0x6b1   :  { %1709 = vsyncpa [#allocation13], 1 }
 0x6b2   :  { %1710 = vsyncpa [#allocation8], 1 }
 0x6b3   :  { %1712 = vsyncpa [#allocation8 + $0x1], 1 }

</bundles_post_ra>
